<compile_context>
chip_gen: v7x
topology: tpu7x:2x2x1
jax: 0.10.0
libtpu: 0.0.40
codegen_flags: <defaults>
</compile_context>

<pallas_src>
import functools

import jax
import jax.numpy as jnp
from jax.experimental import pallas as pl
from jax.experimental.pallas import tpu as pltpu


# ----------------------------------------------------------------------------
# Kernel: one batch-block (bblk elements, R = bblk*L rows) per grid step.
# ----------------------------------------------------------------------------
def transformer_block_kernel(
    x_ref,                      # (R, D)  f32   flattened (batch-block x seq) rows
    pos_ref,                    # (R, 1)  int32 sequence position of each row
    g1_ref, be1_ref,            # (1, D)  f32   norm1
    wqkv_t_ref,                 # (D, 3D) bf16  in_proj^T (softmax scale folded into q)
    bqkv_ref,                   # (1, 3D) f32
    wo_t_ref,                   # (D, D)  bf16  out_proj^T
    bo_ref,                     # (1, D)  f32
    g2_ref, be2_ref,            # (1, D)  f32   norm2
    wf1_t_ref, bf1_ref,         # (D, F) bf16, (1, F) f32   conv1d k=1
    w2a_t_ref, w2b_t_ref, w2c_t_ref, bf2_ref,   # (F, F) bf16 x3, (1, F) f32  conv1d k=3
    wf3_t_ref, bf3_ref,         # (F, D) bf16, (1, D) f32   conv1d k=1
    o_ref,                      # (R, D)  f32
    qkv_s,                      # scratch VMEM (R, 3D) f32
    attn_s,                     # scratch VMEM (R, D)  f32
    *,
    nhead: int,
    seq_len: int,
):
    f32 = jnp.float32
    bf16 = jnp.bfloat16
    eps = 1e-6                                 # module uses LayerNorm(eps=1e-6)

    x = x_ref[...]                             # (R, D) f32
    R, D = x.shape
    L = seq_len
    bblk = R // L
    dh = D // nhead

    def layer_norm(v, g, b):
        mu = jnp.mean(v, axis=-1, keepdims=True)
        var = jnp.mean((v - mu) ** 2, axis=-1, keepdims=True)
        return (v - mu) * jax.lax.rsqrt(var + eps) * g + b

    # ---- residual 1: LN -> MHA -> (dropout = identity) -> + res -------------
    xn = layer_norm(x, g1_ref[...], be1_ref[...])
    qkv_s[...] = (
        jnp.dot(xn.astype(bf16), wqkv_t_ref[...], preferred_element_type=f32)
        + bqkv_ref[...]                        # (R, 3D); q part already pre-scaled
    )

    def attn_block(b, carry):
        # one batch element: L query rows against its own L key/value rows
        r0 = pl.multiple_of(b * L, 8)
        qkv_b = qkv_s[pl.ds(r0, L), :]                              # (L, 3D) f32
        heads = []
        for h in range(nhead):                                      # small static unroll
            c0 = h * dh
            qh = qkv_b[:, c0:c0 + dh].astype(bf16)                  # (L, dh)
            kh = qkv_b[:, D + c0:D + c0 + dh].astype(bf16)          # (L, dh)
            vh = qkv_b[:, 2 * D + c0:2 * D + c0 + dh].astype(bf16)  # (L, dh)
            # q @ k^T without an explicit transpose: contract the last dims.
            s = jax.lax.dot_general(qh, kh, (((1,), (1,)), ((), ())),
                                    preferred_element_type=f32)     # (L, L)
            s = s - jnp.max(s, axis=-1, keepdims=True)
            p = jnp.exp(s)
            p = p * pl.reciprocal(jnp.sum(p, axis=-1, keepdims=True), approx=True)
            heads.append(jnp.dot(p.astype(bf16), vh,
                                 preferred_element_type=f32))       # (L, dh)
        # lane-concat the heads for this block; out-projection is done once
        # over the whole (R, D) slab after the loop.
        attn_s[pl.ds(r0, L), :] = jnp.concatenate(heads, axis=-1)   # (L, D)
        return carry

    jax.lax.fori_loop(0, bblk, attn_block, 0)

    attn_out = jnp.dot(attn_s[...].astype(bf16), wo_t_ref[...],
                       preferred_element_type=f32)                  # (R, D)
    x1 = attn_out + bo_ref[...] + x_ref[...]
    attn_s[...] = x1                           # stash the residual for the tail

    # ---- residual 2: LN -> Conv1d(k1) -> ReLU -> Conv1d(k3,p1) -> ReLU ------
    # ---- -> Conv1d(k1) -> + res ---------------------------------------------
    xn2 = layer_norm(x1, g2_ref[...], be2_ref[...])

    h1 = jnp.dot(xn2.astype(bf16), wf1_t_ref[...], preferred_element_type=f32)
    h1 = jnp.maximum(h1 + bf1_ref[...], 0.0)                        # (R, F) f32

    # conv1d k=3, padding=1 along the per-element sequence axis: shift the
    # flattened row slab (XLU roll) and zero the rows that crossed a sequence
    # boundary (including the roll wrap-around).
    pos = pos_ref[...]                                              # (R, 1) int32
    h_prev = jnp.where(pos != 0, pltpu.roll(h1, shift=1, axis=0), 0.0)
    h_next = jnp.where(pos != L - 1, pltpu.roll(h1, shift=R - 1, axis=0), 0.0)

    # three accumulating K=F MXU dots (no lane-axis concat of sub-128 chunks)
    h2 = jnp.dot(h1.astype(bf16), w2b_t_ref[...], preferred_element_type=f32)
    h2 = h2 + jnp.dot(h_prev.astype(bf16), w2a_t_ref[...], preferred_element_type=f32)
    h2 = h2 + jnp.dot(h_next.astype(bf16), w2c_t_ref[...], preferred_element_type=f32)
    h2 = jnp.maximum(h2 + bf2_ref[...], 0.0)                        # (R, F)

    h3 = jnp.dot(h2.astype(bf16), wf3_t_ref[...], preferred_element_type=f32)
    o_ref[...] = h3 + bf3_ref[...] + attn_s[...]                    # single epilogue store


# ----------------------------------------------------------------------------
# Wrapper helpers
# ----------------------------------------------------------------------------
def _num_tensorcores():
    """Heuristic TensorCore count per chip (megacore chips get 2)."""
    try:
        kind = jax.devices()[0].device_kind.lower()
    except Exception:
        return 1
    return 2 if any(t in kind for t in ("v4", "v5p", "v7", "7x")) else 1


def _vmem_estimate(R, D, F):
    """Rough per-step VMEM footprint (bytes) incl. double-buffered windows."""
    f32, bf16 = 4, 2
    lane = lambda n: ((n + 127) // 128) * 128
    sub = lambda n: ((n + 7) // 8) * 8
    pad2 = lambda r, c, b: sub(r) * lane(c) * b
    io = 2 * 2 * pad2(R, D, f32)                         # x + out, double-buffered
    posb = 2 * pad2(R, 1, f32)
    weights = (pad2(D, 3 * D, bf16) + pad2(D, D, bf16) + pad2(D, F, bf16)
               + 3 * pad2(F, F, bf16) + pad2(F, D, bf16))
    biases = (pad2(1, 3 * D, f32) + 6 * pad2(1, D, f32) + 2 * pad2(1, F, f32))
    invariants = 2 * (weights + biases)                  # default double-buffering
    scratch = pad2(R, 3 * D, f32) + pad2(R, D, f32)
    live = pad2(R, 3 * D, f32) + 3 * pad2(R, F, f32) + 3 * pad2(R, D, f32)
    return io + posb + invariants + scratch + live


def _pick_block_b(batch, L, D, F, ncores, target_rows, vmem_budget):
    """Largest divisor of `batch` whose row slab fits the VMEM budget while
    keeping one grid step per TensorCore on multi-TC chips."""
    want_steps = min(ncores, batch) if ncores > 1 else 1
    best = None
    for d in range(1, batch + 1):
        if batch % d:
            continue
        R = d * L
        if not (R % 8 == 0 or d == batch):
            continue                    # BlockSpec sublane divisibility rule
        if d > 1 and L % 8 != 0:
            continue                    # in-kernel row slicing wants 8-aligned L
        if d != 1:
            if R > target_rows:
                continue
            if _vmem_estimate(R, D, F) > vmem_budget:
                continue
            if batch // d < want_steps:
                continue
        best = d
    return 1 if best is None else best


# ----------------------------------------------------------------------------
# Wrapper
# ----------------------------------------------------------------------------
def transformer_block(x, params, nhead, *, block_b=None, target_rows=512,
                      vmem_budget_bytes=40 * 1024 * 1024):
    """x: (B, d_model, L) float32, same layout as the PyTorch module."""
    B, D, L = x.shape
    F = params["wf1"].shape[0]
    assert D % nhead == 0
    dh = D // nhead

    ncores = _num_tensorcores()
    bblk = (_pick_block_b(B, L, D, F, ncores, target_rows, vmem_budget_bytes)
            if block_b is None else block_b)
    assert B % bblk == 0, "block_b must divide the batch"
    R = bblk * L
    # TODO(synk): sequences with L % 8 != 0 and bblk > 1 need a padded-L path.
    assert R % 8 == 0 or bblk == B, "bblk*L must be a multiple of 8 (f32 sublane)"
    grid = (B // bblk,)

    # NCL -> row-major (B*L, D) rows (one XLA copy; pure layout plumbing).
    xt = jnp.transpose(x, (0, 2, 1)).reshape(B * L, D)

    # ---- host-side weight prep: transpose, fold scale, bf16 -----------------
    scale = dh ** -0.5
    wqkv_scaled = params["wqkv"].at[:D, :].multiply(scale)        # scale q rows
    bqkv_scaled = params["bqkv"].at[:, :D].multiply(scale)
    wqkv_t = wqkv_scaled.T.astype(jnp.bfloat16)                   # (D, 3D)
    wo_t = params["wo"].T.astype(jnp.bfloat16)                    # (D, D)
    wf1_t = params["wf1"].T.astype(jnp.bfloat16)                  # (D, F)
    w2a_t = params["w2a"].T.astype(jnp.bfloat16)                  # (F, F)
    w2b_t = params["w2b"].T.astype(jnp.bfloat16)
    w2c_t = params["w2c"].T.astype(jnp.bfloat16)
    wf3_t = params["wf3"].T.astype(jnp.bfloat16)                  # (F, D)

    # per-row sequence position (grid-invariant: the pattern repeats every L)
    pos = (jnp.arange(R, dtype=jnp.int32) % L).reshape(R, 1)

    def const_spec(shape):
        zeros = (0,) * len(shape)
        return pl.BlockSpec(shape, lambda i, z=zeros: z)

    in_specs = [
        pl.BlockSpec((R, D), lambda i: (i, 0)),                   # x rows
        const_spec((R, 1)),                                       # pos
        const_spec((1, D)), const_spec((1, D)),                   # norm1 gamma/beta
        const_spec((D, 3 * D)), const_spec((1, 3 * D)),           # in_proj W^T / b
        const_spec((D, D)), const_spec((1, D)),                   # out_proj W^T / b
        const_spec((1, D)), const_spec((1, D)),                   # norm2 gamma/beta
        const_spec((D, F)), const_spec((1, F)),                   # conv1 (k=1)
        const_spec((F, F)), const_spec((F, F)), const_spec((F, F)),
        const_spec((1, F)),                                       # conv2 (k=3) taps
        const_spec((F, D)), const_spec((1, D)),                   # conv3 (k=1)
    ]

    kernel = functools.partial(transformer_block_kernel, nhead=nhead, seq_len=L)
    out = pl.pallas_call(
        kernel,
        grid=grid,
        in_specs=in_specs,
        out_specs=pl.BlockSpec((R, D), lambda i: (i, 0)),
        out_shape=jax.ShapeDtypeStruct((B * L, D), jnp.float32),
        scratch_shapes=[
            pltpu.VMEM((R, 3 * D), jnp.float32),                  # qkv
            pltpu.VMEM((R, D), jnp.float32),                      # head-concat / residual
        ],
        compiler_params=pltpu.CompilerParams(
            dimension_semantics=("parallel",),
            vmem_limit_bytes=vmem_budget_bytes,
        ),
    )(
        xt, pos,
        params["g1"], params["be1"],
        wqkv_t, bqkv_scaled,
        wo_t, params["bo"],
        params["g2"], params["be2"],
        wf1_t, params["bf1"],
        w2a_t, w2b_t, w2c_t, params["bf2"],
        wf3_t, params["bf3"],
    )
    return jnp.transpose(out.reshape(B, L, D), (0, 2, 1))         # back to (B, d_model, L)


# ----------------------------------------------------------------------------
# Pure-JAX f32 reference (same math), used only to sanity-check the kernel.
# ----------------------------------------------------------------------------
def reference(x, p, nhead):
    B, D, L = x.shape
    xt = jnp.transpose(x, (0, 2, 1))

    def ln(v, g, b):
        mu = v.mean(-1, keepdims=True)
        var = ((v - mu) ** 2).mean(-1, keepdims=True)
        return (v - mu) / jnp.sqrt(var + 1e-6) * g + b

    res = xt
    xn = ln(xt, p["g1"], p["be1"])
    qkv = xn @ p["wqkv"].T + p["bqkv"]
    q, k, v = jnp.split(qkv, 3, axis=-1)
    dh = D // nhead
    qh = q.reshape(B, L, nhead, dh).transpose(0, 2, 1, 3)
    kh = k.reshape(B, L, nhead, dh).transpose(0, 2, 1, 3)
    vh = v.reshape(B, L, nhead, dh).transpose(0, 2, 1, 3)
    s = jnp.einsum("bhid,bhjd->bhij", qh, kh) * (dh ** -0.5)
    a = jax.nn.softmax(s, axis=-1)
    o = jnp.einsum("bhij,bhjd->bhid", a, vh).transpose(0, 2, 1, 3).reshape(B, L, D)
    o = o @ p["wo"].T + p["bo"]
    x1 = o + res
    res2 = x1
    xn2 = ln(x1, p["g2"], p["be2"])
    h1 = jax.nn.relu(xn2 @ p["wf1"].T + p["bf1"])
    hprev = jnp.concatenate([jnp.zeros_like(h1[:, :1]), h1[:, :-1]], axis=1)
    hnext = jnp.concatenate([h1[:, 1:], jnp.zeros_like(h1[:, :1])], axis=1)
    h2 = jax.nn.relu(hprev @ p["w2a"].T + h1 @ p["w2b"].T + hnext @ p["w2c"].T + p["bf2"])
    h3 = h2 @ p["wf3"].T + p["bf3"]
    return jnp.transpose(h3 + res2, (0, 2, 1))


# ----------------------------------------------------------------------------
def make_params(key, d_model, nhead, ff_dim):
    D, F = d_model, ff_dim
    ks = jax.random.split(key, 16)
    r = lambda k, s, sc=0.05: sc * jax.random.normal(k, s, jnp.float32)
    w2 = r(ks[8], (F, F, 3))                       # conv2 weight (out, in, k)
    return {
        "g1":   1.0 + r(ks[0], (1, D), 0.1),
        "be1":  r(ks[1], (1, D), 0.1),
        "wqkv": r(ks[2], (3 * D, D)),
        "bqkv": r(ks[3], (1, 3 * D)),
        "wo":   r(ks[4], (D, D)),
        "bo":   r(ks[5], (1, D)),
        "g2":   1.0 + r(ks[6], (1, D), 0.1),
        "be2":  r(ks[7], (1, D), 0.1),
        "wf1":  r(ks[9], (F, D)),
        "bf1":  r(ks[10], (1, F)),
        "w2a":  w2[:, :, 0],      # tap for x[l-1]
        "w2b":  w2[:, :, 1],      # tap for x[l]
        "w2c":  w2[:, :, 2],      # tap for x[l+1]
        "bf2":  r(ks[11], (1, F)),
        "wf3":  r(ks[12], (D, F)),
        "bf3":  r(ks[13], (1, D)),
    }


if __name__ == "__main__":
    # Small shapes consistent with the module: d_model=32, nhead=4, ff_dim=64.
    B, d_model, nhead, ff_dim, L = 2, 32, 4, 64, 8

    key = jax.random.PRNGKey(0)
    kx, kp = jax.random.split(key)
    x = jax.random.normal(kx, (B, d_model, L), jnp.float32)
    params = make_params(kp, d_model, nhead, ff_dim)

    out = jax.block_until_ready(transformer_block(x, params, nhead))
    ref = jax.block_until_ready(reference(x, params, nhead))

    assert out.shape == (B, d_model, L)
    max_err = float(jnp.max(jnp.abs(out - ref)))
    # bf16 MXU inputs + approx reciprocal -> loose-but-meaningful tolerance vs f32 ref
    assert bool(jnp.allclose(out, ref, rtol=3e-2, atol=3e-2)), (
        f"mismatch vs reference (max abs err {max_err})")
    print("KERNEL_OK")
</pallas_src>

<mosaic_0001>
module attributes {stable_mosaic.version = 11 : i64} {
  func.func @transformer_block_kernel(%arg0: i32, %arg1: memref<16x32xf32, #tpu.memory_space<vmem>>, %arg2: memref<16x1xi32, #tpu.memory_space<vmem>>, %arg3: memref<1x32xf32, #tpu.memory_space<vmem>>, %arg4: memref<1x32xf32, #tpu.memory_space<vmem>>, %arg5: memref<32x96xbf16, #tpu.memory_space<vmem>>, %arg6: memref<1x96xf32, #tpu.memory_space<vmem>>, %arg7: memref<32x32xbf16, #tpu.memory_space<vmem>>, %arg8: memref<1x32xf32, #tpu.memory_space<vmem>>, %arg9: memref<1x32xf32, #tpu.memory_space<vmem>>, %arg10: memref<1x32xf32, #tpu.memory_space<vmem>>, %arg11: memref<32x64xbf16, #tpu.memory_space<vmem>>, %arg12: memref<1x64xf32, #tpu.memory_space<vmem>>, %arg13: memref<64x64xbf16, #tpu.memory_space<vmem>>, %arg14: memref<64x64xbf16, #tpu.memory_space<vmem>>, %arg15: memref<64x64xbf16, #tpu.memory_space<vmem>>, %arg16: memref<1x64xf32, #tpu.memory_space<vmem>>, %arg17: memref<64x32xbf16, #tpu.memory_space<vmem>>, %arg18: memref<1x32xf32, #tpu.memory_space<vmem>>, %arg19: memref<16x32xf32, #tpu.memory_space<vmem>>, %arg20: memref<16x96xf32, #tpu.memory_space<vmem>>, %arg21: memref<16x32xf32, #tpu.memory_space<vmem>>) attributes {dimension_semantics = [#tpu.dimension_semantics<parallel>], iteration_bounds = array<i64: 1>, scalar_prefetch = 0 : i64, scratch_operands = 2 : i64, tpu.core_type = #tpu.core_type<tc>, window_params = [{transform_indices = @transform_0, window_bounds = array<i64: 16, 32>}, {pipeline_mode = #tpu.pipeline_mode<synchronous>, transform_indices = @transform_1, window_bounds = array<i64: 16, 1>}, {pipeline_mode = #tpu.pipeline_mode<synchronous>, transform_indices = @transform_2, window_bounds = array<i64: 1, 32>}, {pipeline_mode = #tpu.pipeline_mode<synchronous>, transform_indices = @transform_3, window_bounds = array<i64: 1, 32>}, {pipeline_mode = #tpu.pipeline_mode<synchronous>, transform_indices = @transform_4, window_bounds = array<i64: 32, 96>}, {pipeline_mode = #tpu.pipeline_mode<synchronous>, transform_indices = @transform_5, window_bounds = array<i64: 1, 96>}, {pipeline_mode = #tpu.pipeline_mode<synchronous>, transform_indices = @transform_6, window_bounds = array<i64: 32, 32>}, {pipeline_mode = #tpu.pipeline_mode<synchronous>, transform_indices = @transform_7, window_bounds = array<i64: 1, 32>}, {pipeline_mode = #tpu.pipeline_mode<synchronous>, transform_indices = @transform_8, window_bounds = array<i64: 1, 32>}, {pipeline_mode = #tpu.pipeline_mode<synchronous>, transform_indices = @transform_9, window_bounds = array<i64: 1, 32>}, {pipeline_mode = #tpu.pipeline_mode<synchronous>, transform_indices = @transform_10, window_bounds = array<i64: 32, 64>}, {pipeline_mode = #tpu.pipeline_mode<synchronous>, transform_indices = @transform_11, window_bounds = array<i64: 1, 64>}, {pipeline_mode = #tpu.pipeline_mode<synchronous>, transform_indices = @transform_12, window_bounds = array<i64: 64, 64>}, {pipeline_mode = #tpu.pipeline_mode<synchronous>, transform_indices = @transform_13, window_bounds = array<i64: 64, 64>}, {pipeline_mode = #tpu.pipeline_mode<synchronous>, transform_indices = @transform_14, window_bounds = array<i64: 64, 64>}, {pipeline_mode = #tpu.pipeline_mode<synchronous>, transform_indices = @transform_15, window_bounds = array<i64: 1, 64>}, {pipeline_mode = #tpu.pipeline_mode<synchronous>, transform_indices = @transform_16, window_bounds = array<i64: 64, 32>}, {pipeline_mode = #tpu.pipeline_mode<synchronous>, transform_indices = @transform_17, window_bounds = array<i64: 1, 32>}, {transform_indices = @transform_18, window_bounds = array<i64: 16, 32>}]} {
    %c0 = arith.constant 0 : index
    %c0_0 = arith.constant 0 : index
    %0 = vector.load %arg1[%c0, %c0_0] : memref<16x32xf32, #tpu.memory_space<vmem>>, vector<16x32xf32>
    %c0_1 = arith.constant 0 : index
    %c0_2 = arith.constant 0 : index
    %1 = vector.load %arg3[%c0_1, %c0_2] : memref<1x32xf32, #tpu.memory_space<vmem>>, vector<1x32xf32>
    %c0_3 = arith.constant 0 : index
    %c0_4 = arith.constant 0 : index
    %2 = vector.load %arg4[%c0_3, %c0_4] : memref<1x32xf32, #tpu.memory_space<vmem>>, vector<1x32xf32>
    %cst = arith.constant dense<0.000000e+00> : vector<16xf32>
    %3 = vector.multi_reduction <add>, %0, %cst [1] : vector<16x32xf32> to vector<16xf32>
    %4 = vector.shape_cast %3 : vector<16xf32> to vector<16x1xf32>
    %cst_5 = arith.constant 3.200000e+01 : f32
    %5 = vector.broadcast %cst_5 : f32 to vector<16x1xf32>
    %6 = arith.divf %4, %5 : vector<16x1xf32>
    %7 = vector.broadcast %6 : vector<16x1xf32> to vector<16x32xf32>
    %8 = arith.subf %0, %7 : vector<16x32xf32>
    %9 = arith.mulf %8, %8 : vector<16x32xf32>
    %cst_6 = arith.constant dense<0.000000e+00> : vector<16xf32>
    %10 = vector.multi_reduction <add>, %9, %cst_6 [1] : vector<16x32xf32> to vector<16xf32>
    %11 = vector.shape_cast %10 : vector<16xf32> to vector<16x1xf32>
    %cst_7 = arith.constant 3.200000e+01 : f32
    %12 = vector.broadcast %cst_7 : f32 to vector<16x1xf32>
    %13 = arith.divf %11, %12 : vector<16x1xf32>
    %14 = vector.broadcast %6 : vector<16x1xf32> to vector<16x32xf32>
    %15 = arith.subf %0, %14 : vector<16x32xf32>
    %cst_8 = arith.constant 9.99999997E-7 : f32
    %16 = vector.broadcast %cst_8 : f32 to vector<16x1xf32>
    %17 = arith.addf %13, %16 : vector<16x1xf32>
    %18 = math.rsqrt %17 : vector<16x1xf32>
    %19 = vector.broadcast %18 : vector<16x1xf32> to vector<16x32xf32>
    %20 = arith.mulf %15, %19 : vector<16x32xf32>
    %21 = vector.broadcast %1 : vector<1x32xf32> to vector<16x32xf32>
    %22 = arith.mulf %20, %21 : vector<16x32xf32>
    %23 = vector.broadcast %2 : vector<1x32xf32> to vector<16x32xf32>
    %24 = arith.addf %22, %23 : vector<16x32xf32>
    %25 = arith.truncf %24 : vector<16x32xf32> to vector<16x32xbf16>
    %c0_9 = arith.constant 0 : index
    %c0_10 = arith.constant 0 : index
    %26 = vector.load %arg5[%c0_9, %c0_10] : memref<32x96xbf16, #tpu.memory_space<vmem>>, vector<32x96xbf16>
    %cst_11 = arith.constant dense<0.000000e+00> : vector<16x96xf32>
    %27 = tpu.matmul %25, %26, %cst_11 {dimension_numbers = #tpu.dot_dimension_numbers<[1], [0], [0], [1], [0, 0, 1, 1], [], []>} : vector<16x32xbf16>, vector<32x96xbf16>, vector<16x96xf32> -> vector<16x96xf32>
    %c0_12 = arith.constant 0 : index
    %c0_13 = arith.constant 0 : index
    %28 = vector.load %arg6[%c0_12, %c0_13] : memref<1x96xf32, #tpu.memory_space<vmem>>, vector<1x96xf32>
    %29 = vector.broadcast %28 : vector<1x96xf32> to vector<16x96xf32>
    %30 = arith.addf %27, %29 : vector<16x96xf32>
    %c0_14 = arith.constant 0 : index
    %c0_15 = arith.constant 0 : index
    %31 = vector.load %arg20[%c0_14, %c0_15] : memref<16x96xf32, #tpu.memory_space<vmem>>, vector<16x96xf32>
    tpu.vector_store %arg20[%c0_14, %c0_15], %30 {strides = array<i32>} : memref<16x96xf32, #tpu.memory_space<vmem>>, vector<16x96xf32>,
    %c0_i32 = arith.constant 0 : i32
    %c2_i32 = arith.constant 2 : i32
    %32 = arith.addi %c0_i32, %c2_i32 : i32
    %c1_i32 = arith.constant 1 : i32
    scf.for %arg22 = %c0_i32 to %32 step %c1_i32  : i32 {
      %c8_i32 = arith.constant 8 : i32
      %115 = arith.muli %arg22, %c8_i32 : i32
      %116 = tpu.assume_multiple %115, 8 : i32
      %117 = arith.index_cast %116 : i32 to index
      %c0_70 = arith.constant 0 : index
      %118 = vector.load %arg20[%117, %c0_70] : memref<16x96xf32, #tpu.memory_space<vmem>>, vector<8x96xf32>
      %119 = vector.extract_strided_slice %118 {offsets = [0, 0], sizes = [8, 8], strides = [1, 1]} : vector<8x96xf32> to vector<8x8xf32>
      %120 = arith.truncf %119 : vector<8x8xf32> to vector<8x8xbf16>
      %121 = vector.extract_strided_slice %118 {offsets = [0, 32], sizes = [8, 8], strides = [1, 1]} : vector<8x96xf32> to vector<8x8xf32>
      %122 = arith.truncf %121 : vector<8x8xf32> to vector<8x8xbf16>
      %123 = vector.extract_strided_slice %118 {offsets = [0, 64], sizes = [8, 8], strides = [1, 1]} : vector<8x96xf32> to vector<8x8xf32>
      %124 = arith.truncf %123 : vector<8x8xf32> to vector<8x8xbf16>
      %cst_71 = arith.constant dense<0.000000e+00> : vector<8x8xf32>
      %125 = tpu.matmul %120, %122, %cst_71 {dimension_numbers = #tpu.dot_dimension_numbers<[1], [1], [0], [0], [0, 0, 1, 0], [], []>} : vector<8x8xbf16>, vector<8x8xbf16>, vector<8x8xf32> -> vector<8x8xf32>
      %cst_72 = arith.constant dense<0xFF800000> : vector<8xf32>
      %126 = vector.multi_reduction <maximumf>, %125, %cst_72 [1] : vector<8x8xf32> to vector<8xf32>
      %127 = vector.shape_cast %126 : vector<8xf32> to vector<8x1xf32>
      %128 = vector.broadcast %127 : vector<8x1xf32> to vector<8x8xf32>
      %129 = arith.subf %125, %128 : vector<8x8xf32>
      %130 = math.exp %129 : vector<8x8xf32>
      %cst_73 = arith.constant dense<0.000000e+00> : vector<8xf32>
      %131 = vector.multi_reduction <add>, %130, %cst_73 [1] : vector<8x8xf32> to vector<8xf32>
      %132 = vector.shape_cast %131 : vector<8xf32> to vector<8x1xf32>
      %133 = tpu.reciprocal %132 {approx = true} : vector<8x1xf32> -> vector<8x1xf32>
      %134 = vector.broadcast %133 : vector<8x1xf32> to vector<8x8xf32>
      %135 = arith.mulf %130, %134 : vector<8x8xf32>
      %136 = arith.truncf %135 : vector<8x8xf32> to vector<8x8xbf16>
      %cst_74 = arith.constant dense<0.000000e+00> : vector<8x8xf32>
      %137 = tpu.matmul %136, %124, %cst_74 {dimension_numbers = #tpu.dot_dimension_numbers<[1], [0], [0], [1], [0, 0, 1, 1], [], []>} : vector<8x8xbf16>, vector<8x8xbf16>, vector<8x8xf32> -> vector<8x8xf32>
      %138 = vector.extract_strided_slice %118 {offsets = [0, 8], sizes = [8, 8], strides = [1, 1]} : vector<8x96xf32> to vector<8x8xf32>
      %139 = arith.truncf %138 : vector<8x8xf32> to vector<8x8xbf16>
      %140 = vector.extract_strided_slice %118 {offsets = [0, 40], sizes = [8, 8], strides = [1, 1]} : vector<8x96xf32> to vector<8x8xf32>
      %141 = arith.truncf %140 : vector<8x8xf32> to vector<8x8xbf16>
      %142 = vector.extract_strided_slice %118 {offsets = [0, 72], sizes = [8, 8], strides = [1, 1]} : vector<8x96xf32> to vector<8x8xf32>
      %143 = arith.truncf %142 : vector<8x8xf32> to vector<8x8xbf16>
      %cst_75 = arith.constant dense<0.000000e+00> : vector<8x8xf32>
      %144 = tpu.matmul %139, %141, %cst_75 {dimension_numbers = #tpu.dot_dimension_numbers<[1], [1], [0], [0], [0, 0, 1, 0], [], []>} : vector<8x8xbf16>, vector<8x8xbf16>, vector<8x8xf32> -> vector<8x8xf32>
      %cst_76 = arith.constant dense<0xFF800000> : vector<8xf32>
      %145 = vector.multi_reduction <maximumf>, %144, %cst_76 [1] : vector<8x8xf32> to vector<8xf32>
      %146 = vector.shape_cast %145 : vector<8xf32> to vector<8x1xf32>
      %147 = vector.broadcast %146 : vector<8x1xf32> to vector<8x8xf32>
      %148 = arith.subf %144, %147 : vector<8x8xf32>
      %149 = math.exp %148 : vector<8x8xf32>
      %cst_77 = arith.constant dense<0.000000e+00> : vector<8xf32>
      %150 = vector.multi_reduction <add>, %149, %cst_77 [1] : vector<8x8xf32> to vector<8xf32>
      %151 = vector.shape_cast %150 : vector<8xf32> to vector<8x1xf32>
      %152 = tpu.reciprocal %151 {approx = true} : vector<8x1xf32> -> vector<8x1xf32>
      %153 = vector.broadcast %152 : vector<8x1xf32> to vector<8x8xf32>
      %154 = arith.mulf %149, %153 : vector<8x8xf32>
      %155 = arith.truncf %154 : vector<8x8xf32> to vector<8x8xbf16>
      %cst_78 = arith.constant dense<0.000000e+00> : vector<8x8xf32>
      %156 = tpu.matmul %155, %143, %cst_78 {dimension_numbers = #tpu.dot_dimension_numbers<[1], [0], [0], [1], [0, 0, 1, 1], [], []>} : vector<8x8xbf16>, vector<8x8xbf16>, vector<8x8xf32> -> vector<8x8xf32>
      %157 = vector.extract_strided_slice %118 {offsets = [0, 16], sizes = [8, 8], strides = [1, 1]} : vector<8x96xf32> to vector<8x8xf32>
      %158 = arith.truncf %157 : vector<8x8xf32> to vector<8x8xbf16>
      %159 = vector.extract_strided_slice %118 {offsets = [0, 48], sizes = [8, 8], strides = [1, 1]} : vector<8x96xf32> to vector<8x8xf32>
      %160 = arith.truncf %159 : vector<8x8xf32> to vector<8x8xbf16>
      %161 = vector.extract_strided_slice %118 {offsets = [0, 80], sizes = [8, 8], strides = [1, 1]} : vector<8x96xf32> to vector<8x8xf32>
      %162 = arith.truncf %161 : vector<8x8xf32> to vector<8x8xbf16>
      %cst_79 = arith.constant dense<0.000000e+00> : vector<8x8xf32>
      %163 = tpu.matmul %158, %160, %cst_79 {dimension_numbers = #tpu.dot_dimension_numbers<[1], [1], [0], [0], [0, 0, 1, 0], [], []>} : vector<8x8xbf16>, vector<8x8xbf16>, vector<8x8xf32> -> vector<8x8xf32>
      %cst_80 = arith.constant dense<0xFF800000> : vector<8xf32>
      %164 = vector.multi_reduction <maximumf>, %163, %cst_80 [1] : vector<8x8xf32> to vector<8xf32>
      %165 = vector.shape_cast %164 : vector<8xf32> to vector<8x1xf32>
      %166 = vector.broadcast %165 : vector<8x1xf32> to vector<8x8xf32>
      %167 = arith.subf %163, %166 : vector<8x8xf32>
      %168 = math.exp %167 : vector<8x8xf32>
      %cst_81 = arith.constant dense<0.000000e+00> : vector<8xf32>
      %169 = vector.multi_reduction <add>, %168, %cst_81 [1] : vector<8x8xf32> to vector<8xf32>
      %170 = vector.shape_cast %169 : vector<8xf32> to vector<8x1xf32>
      %171 = tpu.reciprocal %170 {approx = true} : vector<8x1xf32> -> vector<8x1xf32>
      %172 = vector.broadcast %171 : vector<8x1xf32> to vector<8x8xf32>
      %173 = arith.mulf %168, %172 : vector<8x8xf32>
      %174 = arith.truncf %173 : vector<8x8xf32> to vector<8x8xbf16>
      %cst_82 = arith.constant dense<0.000000e+00> : vector<8x8xf32>
      %175 = tpu.matmul %174, %162, %cst_82 {dimension_numbers = #tpu.dot_dimension_numbers<[1], [0], [0], [1], [0, 0, 1, 1], [], []>} : vector<8x8xbf16>, vector<8x8xbf16>, vector<8x8xf32> -> vector<8x8xf32>
      %176 = vector.extract_strided_slice %118 {offsets = [0, 24], sizes = [8, 8], strides = [1, 1]} : vector<8x96xf32> to vector<8x8xf32>
      %177 = arith.truncf %176 : vector<8x8xf32> to vector<8x8xbf16>
      %178 = vector.extract_strided_slice %118 {offsets = [0, 56], sizes = [8, 8], strides = [1, 1]} : vector<8x96xf32> to vector<8x8xf32>
      %179 = arith.truncf %178 : vector<8x8xf32> to vector<8x8xbf16>
      %180 = vector.extract_strided_slice %118 {offsets = [0, 88], sizes = [8, 8], strides = [1, 1]} : vector<8x96xf32> to vector<8x8xf32>
      %181 = arith.truncf %180 : vector<8x8xf32> to vector<8x8xbf16>
      %cst_83 = arith.constant dense<0.000000e+00> : vector<8x8xf32>
      %182 = tpu.matmul %177, %179, %cst_83 {dimension_numbers = #tpu.dot_dimension_numbers<[1], [1], [0], [0], [0, 0, 1, 0], [], []>} : vector<8x8xbf16>, vector<8x8xbf16>, vector<8x8xf32> -> vector<8x8xf32>
      %cst_84 = arith.constant dense<0xFF800000> : vector<8xf32>
      %183 = vector.multi_reduction <maximumf>, %182, %cst_84 [1] : vector<8x8xf32> to vector<8xf32>
      %184 = vector.shape_cast %183 : vector<8xf32> to vector<8x1xf32>
      %185 = vector.broadcast %184 : vector<8x1xf32> to vector<8x8xf32>
      %186 = arith.subf %182, %185 : vector<8x8xf32>
      %187 = math.exp %186 : vector<8x8xf32>
      %cst_85 = arith.constant dense<0.000000e+00> : vector<8xf32>
      %188 = vector.multi_reduction <add>, %187, %cst_85 [1] : vector<8x8xf32> to vector<8xf32>
      %189 = vector.shape_cast %188 : vector<8xf32> to vector<8x1xf32>
      %190 = tpu.reciprocal %189 {approx = true} : vector<8x1xf32> -> vector<8x1xf32>
      %191 = vector.broadcast %190 : vector<8x1xf32> to vector<8x8xf32>
      %192 = arith.mulf %187, %191 : vector<8x8xf32>
      %193 = arith.truncf %192 : vector<8x8xf32> to vector<8x8xbf16>
      %cst_86 = arith.constant dense<0.000000e+00> : vector<8x8xf32>
      %194 = tpu.matmul %193, %181, %cst_86 {dimension_numbers = #tpu.dot_dimension_numbers<[1], [0], [0], [1], [0, 0, 1, 1], [], []>} : vector<8x8xbf16>, vector<8x8xbf16>, vector<8x8xf32> -> vector<8x8xf32>
      %195 = tpu.concatenate %137, %156, %175, %194 in 1 : vector<8x8xf32>, vector<8x8xf32>, vector<8x8xf32>, vector<8x8xf32> -> vector<8x32xf32>
      %196 = arith.index_cast %116 : i32 to index
      %c0_87 = arith.constant 0 : index
      %197 = vector.load %arg21[%196, %c0_87] : memref<16x32xf32, #tpu.memory_space<vmem>>, vector<8x32xf32>
      tpu.vector_store %arg21[%196, %c0_87], %195 {strides = array<i32>} : memref<16x32xf32, #tpu.memory_space<vmem>>, vector<8x32xf32>,
    }
    %c2_i32_16 = arith.constant 2 : i32
    %c0_17 = arith.constant 0 : index
    %c0_18 = arith.constant 0 : index
    %33 = vector.load %arg21[%c0_17, %c0_18] : memref<16x32xf32, #tpu.memory_space<vmem>>, vector<16x32xf32>
    %34 = arith.truncf %33 : vector<16x32xf32> to vector<16x32xbf16>
    %c0_19 = arith.constant 0 : index
    %c0_20 = arith.constant 0 : index
    %35 = vector.load %arg7[%c0_19, %c0_20] : memref<32x32xbf16, #tpu.memory_space<vmem>>, vector<32x32xbf16>
    %cst_21 = arith.constant dense<0.000000e+00> : vector<16x32xf32>
    %36 = tpu.matmul %34, %35, %cst_21 {dimension_numbers = #tpu.dot_dimension_numbers<[1], [0], [0], [1], [0, 0, 1, 1], [], []>} : vector<16x32xbf16>, vector<32x32xbf16>, vector<16x32xf32> -> vector<16x32xf32>
    %c0_22 = arith.constant 0 : index
    %c0_23 = arith.constant 0 : index
    %37 = vector.load %arg8[%c0_22, %c0_23] : memref<1x32xf32, #tpu.memory_space<vmem>>, vector<1x32xf32>
    %38 = vector.broadcast %37 : vector<1x32xf32> to vector<16x32xf32>
    %39 = arith.addf %36, %38 : vector<16x32xf32>
    %c0_24 = arith.constant 0 : index
    %c0_25 = arith.constant 0 : index
    %40 = vector.load %arg1[%c0_24, %c0_25] : memref<16x32xf32, #tpu.memory_space<vmem>>, vector<16x32xf32>
    %41 = arith.addf %39, %40 : vector<16x32xf32>
    %c0_26 = arith.constant 0 : index
    %c0_27 = arith.constant 0 : index
    %42 = vector.load %arg21[%c0_26, %c0_27] : memref<16x32xf32, #tpu.memory_space<vmem>>, vector<16x32xf32>
    tpu.vector_store %arg21[%c0_26, %c0_27], %41 {strides = array<i32>} : memref<16x32xf32, #tpu.memory_space<vmem>>, vector<16x32xf32>,
    %c0_28 = arith.constant 0 : index
    %c0_29 = arith.constant 0 : index
    %43 = vector.load %arg9[%c0_28, %c0_29] : memref<1x32xf32, #tpu.memory_space<vmem>>, vector<1x32xf32>
    %c0_30 = arith.constant 0 : index
    %c0_31 = arith.constant 0 : index
    %44 = vector.load %arg10[%c0_30, %c0_31] : memref<1x32xf32, #tpu.memory_space<vmem>>, vector<1x32xf32>
    %cst_32 = arith.constant dense<0.000000e+00> : vector<16xf32>
    %45 = vector.multi_reduction <add>, %41, %cst_32 [1] : vector<16x32xf32> to vector<16xf32>
    %46 = vector.shape_cast %45 : vector<16xf32> to vector<16x1xf32>
    %cst_33 = arith.constant 3.200000e+01 : f32
    %47 = vector.broadcast %cst_33 : f32 to vector<16x1xf32>
    %48 = arith.divf %46, %47 : vector<16x1xf32>
    %49 = vector.broadcast %48 : vector<16x1xf32> to vector<16x32xf32>
    %50 = arith.subf %41, %49 : vector<16x32xf32>
    %51 = arith.mulf %50, %50 : vector<16x32xf32>
    %cst_34 = arith.constant dense<0.000000e+00> : vector<16xf32>
    %52 = vector.multi_reduction <add>, %51, %cst_34 [1] : vector<16x32xf32> to vector<16xf32>
    %53 = vector.shape_cast %52 : vector<16xf32> to vector<16x1xf32>
    %cst_35 = arith.constant 3.200000e+01 : f32
    %54 = vector.broadcast %cst_35 : f32 to vector<16x1xf32>
    %55 = arith.divf %53, %54 : vector<16x1xf32>
    %56 = vector.broadcast %48 : vector<16x1xf32> to vector<16x32xf32>
    %57 = arith.subf %41, %56 : vector<16x32xf32>
    %cst_36 = arith.constant 9.99999997E-7 : f32
    %58 = vector.broadcast %cst_36 : f32 to vector<16x1xf32>
    %59 = arith.addf %55, %58 : vector<16x1xf32>
    %60 = math.rsqrt %59 : vector<16x1xf32>
    %61 = vector.broadcast %60 : vector<16x1xf32> to vector<16x32xf32>
    %62 = arith.mulf %57, %61 : vector<16x32xf32>
    %63 = vector.broadcast %43 : vector<1x32xf32> to vector<16x32xf32>
    %64 = arith.mulf %62, %63 : vector<16x32xf32>
    %65 = vector.broadcast %44 : vector<1x32xf32> to vector<16x32xf32>
    %66 = arith.addf %64, %65 : vector<16x32xf32>
    %67 = arith.truncf %66 : vector<16x32xf32> to vector<16x32xbf16>
    %c0_37 = arith.constant 0 : index
    %c0_38 = arith.constant 0 : index
    %68 = vector.load %arg11[%c0_37, %c0_38] : memref<32x64xbf16, #tpu.memory_space<vmem>>, vector<32x64xbf16>
    %cst_39 = arith.constant dense<0.000000e+00> : vector<16x64xf32>
    %69 = tpu.matmul %67, %68, %cst_39 {dimension_numbers = #tpu.dot_dimension_numbers<[1], [0], [0], [1], [0, 0, 1, 1], [], []>} : vector<16x32xbf16>, vector<32x64xbf16>, vector<16x64xf32> -> vector<16x64xf32>
    %c0_40 = arith.constant 0 : index
    %c0_41 = arith.constant 0 : index
    %70 = vector.load %arg12[%c0_40, %c0_41] : memref<1x64xf32, #tpu.memory_space<vmem>>, vector<1x64xf32>
    %71 = vector.broadcast %70 : vector<1x64xf32> to vector<16x64xf32>
    %72 = arith.addf %69, %71 : vector<16x64xf32>
    %cst_42 = arith.constant 0.000000e+00 : f32
    %73 = vector.broadcast %cst_42 : f32 to vector<16x64xf32>
    %74 = arith.maximumf %72, %73 : vector<16x64xf32>
    %c0_43 = arith.constant 0 : index
    %c0_44 = arith.constant 0 : index
    %75 = vector.load %arg2[%c0_43, %c0_44] : memref<16x1xi32, #tpu.memory_space<vmem>>, vector<16x1xi32>
    %c0_i32_45 = arith.constant 0 : i32
    %76 = vector.broadcast %c0_i32_45 : i32 to vector<16x1xi32>
    %77 = arith.cmpi ne, %75, %76 : vector<16x1xi32>
    %c1_i32_46 = arith.constant 1 : i32
    %78 = tpu.dynamic_rotate %74 by %c1_i32_46 dim 0 : vector<16x64xf32>, i32 -> vector<16x64xf32>
    %cst_47 = arith.constant 0.000000e+00 : f32
    %79 = vector.shape_cast %77 : vector<16x1xi1> to vector<16x1xi1>
    %80 = vector.broadcast %79 : vector<16x1xi1> to vector<16x64xi1>
    %81 = vector.broadcast %cst_47 : f32 to vector<16x64xf32>
    %82 = arith.select %80, %78, %81 : vector<16x64xi1>, vector<16x64xf32>
    %c7_i32 = arith.constant 7 : i32
    %83 = vector.broadcast %c7_i32 : i32 to vector<16x1xi32>
    %84 = arith.cmpi ne, %75, %83 : vector<16x1xi32>
    %c15_i32 = arith.constant 15 : i32
    %85 = tpu.dynamic_rotate %74 by %c15_i32 dim 0 : vector<16x64xf32>, i32 -> vector<16x64xf32>
    %cst_48 = arith.constant 0.000000e+00 : f32
    %86 = vector.shape_cast %84 : vector<16x1xi1> to vector<16x1xi1>
    %87 = vector.broadcast %86 : vector<16x1xi1> to vector<16x64xi1>
    %88 = vector.broadcast %cst_48 : f32 to vector<16x64xf32>
    %89 = arith.select %87, %85, %88 : vector<16x64xi1>, vector<16x64xf32>
    %90 = arith.truncf %74 : vector<16x64xf32> to vector<16x64xbf16>
    %c0_49 = arith.constant 0 : index
    %c0_50 = arith.constant 0 : index
    %91 = vector.load %arg14[%c0_49, %c0_50] : memref<64x64xbf16, #tpu.memory_space<vmem>>, vector<64x64xbf16>
    %cst_51 = arith.constant dense<0.000000e+00> : vector<16x64xf32>
    %92 = tpu.matmul %90, %91, %cst_51 {dimension_numbers = #tpu.dot_dimension_numbers<[1], [0], [0], [1], [0, 0, 1, 1], [], []>} : vector<16x64xbf16>, vector<64x64xbf16>, vector<16x64xf32> -> vector<16x64xf32>
    %93 = arith.truncf %82 : vector<16x64xf32> to vector<16x64xbf16>
    %c0_52 = arith.constant 0 : index
    %c0_53 = arith.constant 0 : index
    %94 = vector.load %arg13[%c0_52, %c0_53] : memref<64x64xbf16, #tpu.memory_space<vmem>>, vector<64x64xbf16>
    %cst_54 = arith.constant dense<0.000000e+00> : vector<16x64xf32>
    %95 = tpu.matmul %93, %94, %cst_54 {dimension_numbers = #tpu.dot_dimension_numbers<[1], [0], [0], [1], [0, 0, 1, 1], [], []>} : vector<16x64xbf16>, vector<64x64xbf16>, vector<16x64xf32> -> vector<16x64xf32>
    %96 = arith.addf %92, %95 : vector<16x64xf32>
    %97 = arith.truncf %89 : vector<16x64xf32> to vector<16x64xbf16>
    %c0_55 = arith.constant 0 : index
    %c0_56 = arith.constant 0 : index
    %98 = vector.load %arg15[%c0_55, %c0_56] : memref<64x64xbf16, #tpu.memory_space<vmem>>, vector<64x64xbf16>
    %cst_57 = arith.constant dense<0.000000e+00> : vector<16x64xf32>
    %99 = tpu.matmul %97, %98, %cst_57 {dimension_numbers = #tpu.dot_dimension_numbers<[1], [0], [0], [1], [0, 0, 1, 1], [], []>} : vector<16x64xbf16>, vector<64x64xbf16>, vector<16x64xf32> -> vector<16x64xf32>
    %100 = arith.addf %96, %99 : vector<16x64xf32>
    %c0_58 = arith.constant 0 : index
    %c0_59 = arith.constant 0 : index
    %101 = vector.load %arg16[%c0_58, %c0_59] : memref<1x64xf32, #tpu.memory_space<vmem>>, vector<1x64xf32>
    %102 = vector.broadcast %101 : vector<1x64xf32> to vector<16x64xf32>
    %103 = arith.addf %100, %102 : vector<16x64xf32>
    %cst_60 = arith.constant 0.000000e+00 : f32
    %104 = vector.broadcast %cst_60 : f32 to vector<16x64xf32>
    %105 = arith.maximumf %103, %104 : vector<16x64xf32>
    %106 = arith.truncf %105 : vector<16x64xf32> to vector<16x64xbf16>
    %c0_61 = arith.constant 0 : index
    %c0_62 = arith.constant 0 : index
    %107 = vector.load %arg17[%c0_61, %c0_62] : memref<64x32xbf16, #tpu.memory_space<vmem>>, vector<64x32xbf16>
    %cst_63 = arith.constant dense<0.000000e+00> : vector<16x32xf32>
    %108 = tpu.matmul %106, %107, %cst_63 {dimension_numbers = #tpu.dot_dimension_numbers<[1], [0], [0], [1], [0, 0, 1, 1], [], []>} : vector<16x64xbf16>, vector<64x32xbf16>, vector<16x32xf32> -> vector<16x32xf32>
    %c0_64 = arith.constant 0 : index
    %c0_65 = arith.constant 0 : index
    %109 = vector.load %arg18[%c0_64, %c0_65] : memref<1x32xf32, #tpu.memory_space<vmem>>, vector<1x32xf32>
    %110 = vector.broadcast %109 : vector<1x32xf32> to vector<16x32xf32>
    %111 = arith.addf %108, %110 : vector<16x32xf32>
    %c0_66 = arith.constant 0 : index
    %c0_67 = arith.constant 0 : index
    %112 = vector.load %arg21[%c0_66, %c0_67] : memref<16x32xf32, #tpu.memory_space<vmem>>, vector<16x32xf32>
    %113 = arith.addf %111, %112 : vector<16x32xf32>
    %c0_68 = arith.constant 0 : index
    %c0_69 = arith.constant 0 : index
    %114 = vector.load %arg19[%c0_68, %c0_69] : memref<16x32xf32, #tpu.memory_space<vmem>>, vector<16x32xf32>
    tpu.vector_store %arg19[%c0_68, %c0_69], %113 {strides = array<i32>} : memref<16x32xf32, #tpu.memory_space<vmem>>, vector<16x32xf32>,
    return
  }
  func.func @transform_0(%arg0: i32) -> (i32, i32) {
    %c0_i32 = arith.constant 0 : i32
    %c0_i32_0 = arith.constant 0 : i32
    return %arg0, %c0_i32 : i32, i32
  }
  func.func @transform_1(%arg0: i32) -> (i32, i32) {
    %c0_i32 = arith.constant 0 : i32
    %c0_i32_0 = arith.constant 0 : i32
    %c0_i32_1 = arith.constant 0 : i32
    return %c0_i32, %c0_i32_0 : i32, i32
  }
  func.func @transform_2(%arg0: i32) -> (i32, i32) {
    %c0_i32 = arith.constant 0 : i32
    %c0_i32_0 = arith.constant 0 : i32
    %c0_i32_1 = arith.constant 0 : i32
    return %c0_i32, %c0_i32_0 : i32, i32
  }
  func.func @transform_3(%arg0: i32) -> (i32, i32) {
    %c0_i32 = arith.constant 0 : i32
    %c0_i32_0 = arith.constant 0 : i32
    %c0_i32_1 = arith.constant 0 : i32
    return %c0_i32, %c0_i32_0 : i32, i32
  }
  func.func @transform_4(%arg0: i32) -> (i32, i32) {
    %c0_i32 = arith.constant 0 : i32
    %c0_i32_0 = arith.constant 0 : i32
    %c0_i32_1 = arith.constant 0 : i32
    return %c0_i32, %c0_i32_0 : i32, i32
  }
  func.func @transform_5(%arg0: i32) -> (i32, i32) {
    %c0_i32 = arith.constant 0 : i32
    %c0_i32_0 = arith.constant 0 : i32
    %c0_i32_1 = arith.constant 0 : i32
    return %c0_i32, %c0_i32_0 : i32, i32
  }
  func.func @transform_6(%arg0: i32) -> (i32, i32) {
    %c0_i32 = arith.constant 0 : i32
    %c0_i32_0 = arith.constant 0 : i32
    %c0_i32_1 = arith.constant 0 : i32
    return %c0_i32, %c0_i32_0 : i32, i32
  }
  func.func @transform_7(%arg0: i32) -> (i32, i32) {
    %c0_i32 = arith.constant 0 : i32
    %c0_i32_0 = arith.constant 0 : i32
    %c0_i32_1 = arith.constant 0 : i32
    return %c0_i32, %c0_i32_0 : i32, i32
  }
  func.func @transform_8(%arg0: i32) -> (i32, i32) {
    %c0_i32 = arith.constant 0 : i32
    %c0_i32_0 = arith.constant 0 : i32
    %c0_i32_1 = arith.constant 0 : i32
    return %c0_i32, %c0_i32_0 : i32, i32
  }
  func.func @transform_9(%arg0: i32) -> (i32, i32) {
    %c0_i32 = arith.constant 0 : i32
    %c0_i32_0 = arith.constant 0 : i32
    %c0_i32_1 = arith.constant 0 : i32
    return %c0_i32, %c0_i32_0 : i32, i32
  }
  func.func @transform_10(%arg0: i32) -> (i32, i32) {
    %c0_i32 = arith.constant 0 : i32
    %c0_i32_0 = arith.constant 0 : i32
    %c0_i32_1 = arith.constant 0 : i32
    return %c0_i32, %c0_i32_0 : i32, i32
  }
  func.func @transform_11(%arg0: i32) -> (i32, i32) {
    %c0_i32 = arith.constant 0 : i32
    %c0_i32_0 = arith.constant 0 : i32
    %c0_i32_1 = arith.constant 0 : i32
    return %c0_i32, %c0_i32_0 : i32, i32
  }
  func.func @transform_12(%arg0: i32) -> (i32, i32) {
    %c0_i32 = arith.constant 0 : i32
    %c0_i32_0 = arith.constant 0 : i32
    %c0_i32_1 = arith.constant 0 : i32
    return %c0_i32, %c0_i32_0 : i32, i32
  }
  func.func @transform_13(%arg0: i32) -> (i32, i32) {
    %c0_i32 = arith.constant 0 : i32
    %c0_i32_0 = arith.constant 0 : i32
    %c0_i32_1 = arith.constant 0 : i32
    return %c0_i32, %c0_i32_0 : i32, i32
  }
  func.func @transform_14(%arg0: i32) -> (i32, i32) {
    %c0_i32 = arith.constant 0 : i32
    %c0_i32_0 = arith.constant 0 : i32
    %c0_i32_1 = arith.constant 0 : i32
    return %c0_i32, %c0_i32_0 : i32, i32
  }
  func.func @transform_15(%arg0: i32) -> (i32, i32) {
    %c0_i32 = arith.constant 0 : i32
    %c0_i32_0 = arith.constant 0 : i32
    %c0_i32_1 = arith.constant 0 : i32
    return %c0_i32, %c0_i32_0 : i32, i32
  }
  func.func @transform_16(%arg0: i32) -> (i32, i32) {
    %c0_i32 = arith.constant 0 : i32
    %c0_i32_0 = arith.constant 0 : i32
    %c0_i32_1 = arith.constant 0 : i32
    return %c0_i32, %c0_i32_0 : i32, i32
  }
  func.func @transform_17(%arg0: i32) -> (i32, i32) {
    %c0_i32 = arith.constant 0 : i32
    %c0_i32_0 = arith.constant 0 : i32
    %c0_i32_1 = arith.constant 0 : i32
    return %c0_i32, %c0_i32_0 : i32, i32
  }
  func.func @transform_18(%arg0: i32) -> (i32, i32) {
    %c0_i32 = arith.constant 0 : i32
    %c0_i32_0 = arith.constant 0 : i32
    return %arg0, %c0_i32 : i32, i32
  }
}

</mosaic_0001>

<bundles_post_ra>
// kernel: tpu_custom_call.1
= control target key start
LH: loop header
LB: loop body
LE: loop exit
PB: predicated region body
PF: predicated region fallthrough
CT: control target
= control target key end

     0   :  { %s2365_s0 = inlined_call_operand.hbm [shape: f32[16,32], index: 0, kind: input, shape index: {}]   ;;  %s2366_s1 = inlined_call_operand.vmem [shape: s32[16,1], index: 1, kind: input, shape index: {}]   ;;  %s2367_s2 = inlined_call_operand.vmem [shape: f32[1,32], index: 2, kind: input, shape index: {}]   ;;  %s2368_s3 = inlined_call_operand.vmem [shape: f32[1,32], index: 3, kind: input, shape index: {}]   ;;  %s2369_s4 = inlined_call_operand.hbm [shape: bf16[32,96], index: 4, kind: input, shape index: {}]   ;;  %s2370_s5 = inlined_call_operand.hbm [shape: f32[1,96], index: 5, kind: input, shape index: {}]   ;;  %s2371_s6 = inlined_call_operand.hbm [shape: bf16[32,32], index: 6, kind: input, shape index: {}]   ;;  %s2372_s7 = inlined_call_operand.hbm [shape: f32[1,32], index: 7, kind: input, shape index: {}]   ;;  %s2373_s8 = inlined_call_operand.hbm [shape: f32[1,32], index: 8, kind: input, shape index: {}]   ;;  %s2374_s9 = inlined_call_operand.hbm [shape: f32[1,32], index: 9, kind: input, shape index: {}]   ;;  %s2375_s10 = inlined_call_operand.hbm [shape: bf16[32,64], index: 10, kind: input, shape index: {}]   ;;  %s2376_s11 = inlined_call_operand.hbm [shape: f32[1,64], index: 11, kind: input, shape index: {}]   ;;  %s2377_s12 = inlined_call_operand.vmem [shape: bf16[64,64], index: 12, kind: input, shape index: {}]   ;;  %s2378_s13 = inlined_call_operand.vmem [shape: bf16[64,64], index: 13, kind: input, shape index: {}]   ;;  %s2379_s14 = inlined_call_operand.vmem [shape: bf16[64,64], index: 14, kind: input, shape index: {}]   ;;  %s2380_s15 = inlined_call_operand.vmem [shape: f32[1,64], index: 15, kind: input, shape index: {}]   ;;  %s2381_s16 = inlined_call_operand.vmem [shape: bf16[64,32], index: 16, kind: input, shape index: {}]   ;;  %s2382_s17 = inlined_call_operand.vmem [shape: f32[1,32], index: 17, kind: input, shape index: {}]   ;;  %s2383_s18 = inlined_call_operand.hbm [shape: f32[16,32], index: 18, kind: output, shape index: {}]  }
   0x1   :  { %2387 = sst [smem:[#allocation26_spill]] %s2365_s0 }
   0x2   :  { %2388 = sst [smem:[#allocation27_spill]] %s2366_s1 }
   0x3   :  { %2389 = sst [smem:[#allocation28_spill]] %s2367_s2 }
   0x4   :  { %2390 = sst [smem:[#allocation29_spill]] %s2383_s18 }
   0x5   :  { %23 = vsyncpa [#allocation5], 0 }
   0x6   :  { %24 = vsyncpa [#allocation8], 0 }
   0x7   :  { %25 = vsyncpa [#allocation11], 0 }
   0x8   :  { %26 = vsyncpa [#allocation14], 0 }
   0x9   :  { %27 = vsyncpa [#allocation17], 0 }
   0xa   :  { %28 = vsyncpa [#allocation6], 0  ;;  %s1900_s27 = smov [#allocation7]   ;;  %s1660_s0 = scalar_lea.hbm %s2369_s4, 256 }
   0xb   :  { %s52_s28 = sshll.u32 %s1900_s27, 4  ;;  %p1661_p0 = scmp.ne.s32.totalorder %s2369_s4, %s1660_s0  ;;  %s53_s28 = int_to_ptr.vmem [resolvable:$true] %s52_s28 }
   0xc   :  { %p1664_p1 = scmp.lt.u32.totalorder %s1660_s0, %s2369_s4 }
   0xe   :  { %p1666_p2 = pnand %p1664_p1, %p1661_p0 }
  0x10   :  { %1669 = shalt.err (!%p1666_p2)
}
  0x11   :  { %s1670_s22 = scalar_lea.vmem %s53_s28, 256  ;;  %p1675_p4 = scmp.lt.s32.totalorder %s53_s28, %s53_s28 }
  0x12   :  { %p1671_p3 = scmp.ne.s32.totalorder %s53_s28, %s1670_s22  ;;  %p1676_p5 = scmp.lt.s32.totalorder %s1670_s22, %s1670_s22 }
  0x14   :  { %p1677_p6 = por %p1676_p5, %p1675_p4 }
  0x16   :  { %p1678_p7 = pnand %p1677_p6, %p1671_p3 }
  0x18   :  { %1681 = shalt.err (!%p1678_p7)
}
  0x19   :  { %s1901_s2 = smov 64   ;;  %s1902_s23 = smov 4  }
  0x1a   :  { %58 = dma.hbm_to_vmem [thread:$0]  %s2369_s4, 256, %s53_s28, [#allocation8], %s1901_s2, %s1901_s2, %s1902_s23  }
  0x1b   :  { %s1903_s26 = smov [#allocation10]   ;;  %s1904_s29 = smov [#allocation13]  }
  0x1c   :  { %s74_s27 = sshll.u32 %s1903_s26, 4  ;;  %s97_s30 = sshll.u32 %s1904_s29, 4  ;;  %s75_s27 = int_to_ptr.vmem [resolvable:$true] %s74_s27  ;;  %s98_s30 = int_to_ptr.vmem [resolvable:$true] %s97_s30 }
  0x1d   :  { %s1682_s1 = scalar_lea.hbm %s2371_s6, 256 }
  0x1e   :  { %p1683_p8 = scmp.ne.s32.totalorder %s2371_s6, %s1682_s1  ;;  %p1686_p9 = scmp.lt.u32.totalorder %s1682_s1, %s2371_s6 }
  0x20   :  { %p1688_p10 = pnand %p1686_p9, %p1683_p8 }
  0x22   :  { %1691 = shalt.err (!%p1688_p10)
}
  0x23   :  { %s1692_s4 = scalar_lea.vmem %s75_s27, 256  ;;  %p1697_p12 = scmp.lt.s32.totalorder %s75_s27, %s75_s27 }
  0x24   :  { %p1693_p11 = scmp.ne.s32.totalorder %s75_s27, %s1692_s4  ;;  %p1698_p13 = scmp.lt.s32.totalorder %s1692_s4, %s1692_s4 }
  0x26   :  { %p1699_p0 = por %p1698_p13, %p1697_p12 }
  0x28   :  { %p1700_p1 = pnand %p1699_p0, %p1693_p11 }
  0x2a   :  { %1703 = shalt.err (!%p1700_p1)
}
  0x2b   :  { %80 = dma.hbm_to_vmem [thread:$0]  %s2371_s6, 256, %s75_s27, [#allocation11], %s1901_s2, %s1901_s2, %s1902_s23  }
  0x2c   :  { %s1704_s26 = scalar_lea.hbm %s2373_s8, 16 }
  0x2d   :  { %p1705_p2 = scmp.ne.s32.totalorder %s2373_s8, %s1704_s26  ;;  %p1708_p3 = scmp.lt.u32.totalorder %s1704_s26, %s2373_s8 }
  0x2f   :  { %p1710_p4 = pnand %p1708_p3, %p1705_p2 }
  0x31   :  { %1713 = shalt.err (!%p1710_p4)
}
  0x32   :  { %s1714_s20 = scalar_lea.vmem %s98_s30, 16  ;;  %s1718_s21 = scalar_lea.vmem %s98_s30, 32 }
  0x33   :  { %p1715_p5 = scmp.ne.s32.totalorder %s98_s30, %s1714_s20  ;;  %p1719_p6 = scmp.lt.s32.totalorder %s98_s30, %s98_s30 }
  0x34   :  { %p1720_p7 = scmp.lt.s32.totalorder %s1718_s21, %s1714_s20 }
  0x36   :  { %p1721_p8 = por %p1720_p7, %p1719_p6 }
  0x38   :  { %p1722_p9 = pnand %p1721_p8, %p1715_p5 }
  0x3a   :  { %1725 = shalt.err (!%p1722_p9)
}
  0x3b   :  { %100 = dma.hbm_to_vmem [thread:$0]  %s2373_s8, 16, %s98_s30, [#allocation14]  }
  0x3c   :  { %s1905_s22 = smov [#allocation16]   ;;  %s1906_s28 = smov [#allocation4]  }
  0x3d   :  { %s116_s4 = sshll.u32 %s1905_s22, 4  ;;  %s34_s24 = sshll.u32 %s1906_s28, 4  ;;  %s117_s4 = int_to_ptr.vmem [resolvable:$true] %s116_s4  ;;  %s35_s24 = int_to_ptr.vmem [resolvable:$true] %s34_s24 }
  0x3e   :  { %s1726_s26 = scalar_lea.hbm %s2375_s10, 256 }
  0x3f   :  { %p1727_p10 = scmp.ne.s32.totalorder %s2375_s10, %s1726_s26  ;;  %p1730_p11 = scmp.lt.u32.totalorder %s1726_s26, %s2375_s10 }
  0x41   :  { %p1732_p12 = pnand %p1730_p11, %p1727_p10 }
  0x43   :  { %1735 = shalt.err (!%p1732_p12)
}
  0x44   :  { %s1736_s8 = scalar_lea.vmem %s117_s4, 256  ;;  %p1741_p0 = scmp.lt.s32.totalorder %s117_s4, %s117_s4 }
  0x45   :  { %p1737_p13 = scmp.ne.s32.totalorder %s117_s4, %s1736_s8  ;;  %p1742_p1 = scmp.lt.s32.totalorder %s1736_s8, %s1736_s8 }
  0x47   :  { %p1743_p2 = por %p1742_p1, %p1741_p0 }
  0x49   :  { %p1744_p3 = pnand %p1743_p2, %p1737_p13 }
  0x4b   :  { %1747 = shalt.err (!%p1744_p3)
}
  0x4c   :  { %122 = dma.hbm_to_vmem [thread:$0]  %s2375_s10, 256, %s117_s4, [#allocation17], %s1901_s2, %s1901_s2, %s1902_s23  }
  0x4d   :  { %s2391_s27 = sld [smem:[#allocation26_spill]] }
  0x53   :  { %s1748_s22 = scalar_lea.hbm %s2391_s27, 256 }
  0x54   :  { %p1749_p4 = scmp.ne.s32.totalorder %s2391_s27, %s1748_s22  ;;  %p1752_p5 = scmp.lt.u32.totalorder %s1748_s22, %s2391_s27 }
  0x56   :  { %p1754_p6 = pnand %p1752_p5, %p1749_p4 }
  0x58   :  { %1757 = shalt.err (!%p1754_p6)
}
  0x59   :  { %s1758_s29 = scalar_lea.vmem %s35_s24, 256  ;;  %p1763_p8 = scmp.lt.s32.totalorder %s35_s24, %s35_s24 }
  0x5a   :  { %p1759_p7 = scmp.ne.s32.totalorder %s35_s24, %s1758_s29  ;;  %p1764_p9 = scmp.lt.s32.totalorder %s1758_s29, %s1758_s29 }
  0x5c   :  { %p1765_p10 = por %p1764_p9, %p1763_p8 }
  0x5e   :  { %p1766_p11 = pnand %p1765_p10, %p1759_p7 }
  0x60   :  { %1769 = shalt.err (!%p1766_p11)
}
  0x61   :  { %s1907_s10 = smov 128   ;;  %s1908_s2 = smov 8  }
  0x62   :  { %40 = dma.hbm_to_vmem [thread:$0]  %s2391_s27, 256, %s35_s24, [#allocation5], %s1907_s10, %s1907_s10, %s1908_s2  }
  0x63   :  { %s1909_s0 = smov [#allocation9]   ;;  %s1910_s1 = smov [#allocation12]  }
  0x64   :  { %s65_s19 = sshll.u32 %s1909_s0, 4  ;;  %s87_s8 = sshll.u32 %s1910_s1, 4  ;;  %s66_s19 = int_to_ptr.vmem [resolvable:$true] %s65_s19  ;;  %s88_s8 = int_to_ptr.vmem [resolvable:$true] %s87_s8 }
  0x65   :  { %s1770_s21 = scalar_lea.hbm %s2370_s5, 16 }
  0x66   :  { %p1771_p12 = scmp.ne.s32.totalorder %s2370_s5, %s1770_s21  ;;  %p1774_p13 = scmp.lt.u32.totalorder %s1770_s21, %s2370_s5 }
  0x68   :  { %p1776_p0 = pnand %p1774_p13, %p1771_p12 }
  0x6a   :  { %1779 = shalt.err (!%p1776_p0)
}
  0x6b   :  { %s1780_s24 = scalar_lea.vmem %s66_s19, 16  ;;  %s1784_s27 = scalar_lea.vmem %s66_s19, 32 }
  0x6c   :  { %p1781_p1 = scmp.ne.s32.totalorder %s66_s19, %s1780_s24  ;;  %p1785_p2 = scmp.lt.s32.totalorder %s66_s19, %s66_s19 }
  0x6d   :  { %p1786_p3 = scmp.lt.s32.totalorder %s1784_s27, %s1780_s24 }
  0x6f   :  { %p1787_p4 = por %p1786_p3, %p1785_p2 }
  0x71   :  { %p1788_p5 = pnand %p1787_p4, %p1781_p1 }
  0x73   :  { %1791 = shalt.err (!%p1788_p5)
}
  0x74   :  { %68 = dma.hbm_to_vmem [thread:$0]  %s2370_s5, 16, %s66_s19, [#allocation8]  }
  0x75   :  { %s1792_s4 = scalar_lea.hbm %s2372_s7, 16 }
  0x76   :  { %p1793_p6 = scmp.ne.s32.totalorder %s2372_s7, %s1792_s4  ;;  %p1796_p7 = scmp.lt.u32.totalorder %s1792_s4, %s2372_s7 }
  0x78   :  { %p1798_p8 = pnand %p1796_p7, %p1793_p6 }
  0x7a   :  { %1801 = shalt.err (!%p1798_p8)
}
  0x7b   :  { %s1802_s21 = scalar_lea.vmem %s88_s8, 16  ;;  %s1806_s6 = scalar_lea.vmem %s88_s8, 32 }
  0x7c   :  { %p1803_p9 = scmp.ne.s32.totalorder %s88_s8, %s1802_s21  ;;  %p1807_p10 = scmp.lt.s32.totalorder %s88_s8, %s88_s8 }
  0x7d   :  { %p1808_p11 = scmp.lt.s32.totalorder %s1806_s6, %s1802_s21 }
  0x7f   :  { %p1809_p12 = por %p1808_p11, %p1807_p10 }
  0x81   :  { %p1810_p13 = pnand %p1809_p12, %p1803_p9 }
  0x83   :  { %1813 = shalt.err (!%p1810_p13)
}
  0x84   :  { %90 = dma.hbm_to_vmem [thread:$0]  %s2372_s7, 16, %s88_s8, [#allocation11]  }
  0x85   :  { %s1911_s22 = smov [#allocation15]   ;;  %s1912_s25 = smov [#allocation18]  }
  0x86   :  { %s107_s28 = sshll.u32 %s1911_s22, 4  ;;  %s129_s24 = sshll.u32 %s1912_s25, 4  ;;  %s108_s28 = int_to_ptr.vmem [resolvable:$true] %s107_s28  ;;  %s130_s24 = int_to_ptr.vmem [resolvable:$true] %s129_s24 }
  0x87   :  { %s1814_s26 = scalar_lea.hbm %s2374_s9, 16 }
  0x88   :  { %p1815_p0 = scmp.ne.s32.totalorder %s2374_s9, %s1814_s26  ;;  %p1818_p1 = scmp.lt.u32.totalorder %s1814_s26, %s2374_s9 }
  0x8a   :  { %p1820_p2 = pnand %p1818_p1, %p1815_p0 }
  0x8c   :  { %1823 = shalt.err (!%p1820_p2)
}
  0x8d   :  { %s1824_s7 = scalar_lea.vmem %s108_s28, 16  ;;  %s1828_s8 = scalar_lea.vmem %s108_s28, 32 }
  0x8e   :  { %p1825_p3 = scmp.ne.s32.totalorder %s108_s28, %s1824_s7  ;;  %p1829_p4 = scmp.lt.s32.totalorder %s108_s28, %s108_s28 }
  0x8f   :  { %p1830_p5 = scmp.lt.s32.totalorder %s1828_s8, %s1824_s7 }
  0x91   :  { %p1831_p6 = por %p1830_p5, %p1829_p4 }
  0x93   :  { %p1832_p7 = pnand %p1831_p6, %p1825_p3 }
  0x95   :  { %1835 = shalt.err (!%p1832_p7)
}
  0x96   :  { %110 = dma.hbm_to_vmem [thread:$0]  %s2374_s9, 16, %s108_s28, [#allocation14]  }
  0x97   :  { %s1836_s6 = scalar_lea.hbm %s2376_s11, 16 }
  0x98   :  { %p1837_p8 = scmp.ne.s32.totalorder %s2376_s11, %s1836_s6  ;;  %p1840_p9 = scmp.lt.u32.totalorder %s1836_s6, %s2376_s11 }
  0x9a   :  { %p1842_p10 = pnand %p1840_p9, %p1837_p8 }
  0x9c   :  { %1845 = shalt.err (!%p1842_p10)
}
  0x9d   :  { %s1846_s27 = scalar_lea.vmem %s130_s24, 16  ;;  %s1850_s18 = scalar_lea.vmem %s130_s24, 32 }
  0x9e   :  { %p1847_p11 = scmp.ne.s32.totalorder %s130_s24, %s1846_s27  ;;  %p1851_p12 = scmp.lt.s32.totalorder %s130_s24, %s130_s24 }
  0x9f   :  { %p1852_p13 = scmp.lt.s32.totalorder %s1850_s18, %s1846_s27 }
  0xa1   :  { %p1853_p0 = por %p1852_p13, %p1851_p12 }
  0xa3   :  { %p1854_p1 = pnand %p1853_p0, %p1847_p11 }
  0xa5   :  { %1857 = shalt.err (!%p1854_p1)
}
  0xa6   :  { %132 = dma.hbm_to_vmem [thread:$0]  %s2376_s11, 16, %s130_s24, [#allocation17]  }
  0xa7   :  { %1884 = dma.done.wait [#allocation5], 256  }
  0xa8   :  { %1885 = vsyncadd [#allocation5], 4294967040 }
  0xa9   :  { %1886 = dma.done.wait [#allocation8], 272  }
  0xaa   :  { %1887 = vsyncadd [#allocation8], 4294967024 }
  0xab   :  { %1888 = dma.done.wait [#allocation11], 272  }
  0xac   :  { %1889 = vsyncadd [#allocation11], 4294967024 }
  0xad   :  { %1890 = dma.done.wait [#allocation14], 32  }
  0xae   :  { %1891 = vsyncadd [#allocation14], 4294967264 }
  0xaf   :  { %1892 = dma.done.wait [#allocation17], 272  }
  0xb0   :  { %1893 = vsyncadd [#allocation17], 4294967024  ;;  %vm177_vm0 = vcmask 261120   ;;  %v173_v0 = vld [vmem:[#allocation4] sm:$0xff]  ;;  %v174_v1 = vld [vmem:[#allocation4 + $0x8] sm:$0xff]  ;;  %v1913_v15 = vmov 0.0  }
  0xb1   :  { %v178_v2 = vsel %vm177_vm0, %v173_v0, 0.0  ;;  %v181_v3 = vsel %vm177_vm0, %v174_v1, 0.0  ;;  %v1612_v14 = vld [vmem:[#allocation7] sm:$0xff]   ;;  %1451 = vmatprep.subr.bf16.mxu0 %v1913_v15  ;;  %v1613_v16 = vld [vmem:[#allocation7 + $0x8] sm:$0xff]   ;;  %vm1914_vm1 = vmmov 0   ;;  %s2392_s26 = sld [smem:[#allocation28_spill]] }
  0xb2   :  { %179 = vadd.xlane.f32.xlu0 %v178_v2  ;;  %1452 = vmatpush3.bf16.msra.mxu0 %v1612_v14  ;;  %v1360_v29 = vld [vmem:[%s2368_s3] ss:$0 sm:$0xff]  ;;  %vm289_vm2 = vcmask 785408   ;;  %s2163_s4 = smov 0  }
  0xb3   :  { %1455 = vmatprep.mubr.msk.bf16.mxu0 %vm1914_vm1, %v1913_v15  ;;  %1453 = vmatprep.subr.bf16.mxu0 %v1913_v15  ;;  %v1361_v34 = vld [vmem:[#allocation9] ss:$0 sm:$0xff] }
  0xb6   :  { %182 = vadd.xlane.f32.xlu0 %v181_v3  ;;  %1454 = vmatpush3.bf16.msra.mxu0 %v1613_v16 }
  0xb7   :  { %v1359_v25 = vld [vmem:[%s2392_s26] ss:$0 sm:$0xff] }
 0x13f   :  { %v180_v4 = vpop.xlane.xlu0 %179 }
 0x140   :  { %v185_v5 = vmul.f32 0.03125, %v180_v4 }
 0x142   :  { %v187_v6 = vsub.f32 %v173_v0, %v185_v5 }
 0x143   :  { %v183_v7 = vpop.xlane.xlu0 %182 }
 0x144   :  { %v186_v8 = vmul.f32 0.03125, %v183_v7  ;;  %v189_v9 = vmul.f32 %v187_v6, %v187_v6 }
 0x146   :  { %v188_v10 = vsub.f32 %v174_v1, %v186_v8  ;;  %v191_v11 = vsel %vm177_vm0, %v189_v9, 0.0 }
 0x147   :  { %192 = vadd.xlane.f32.xlu1 %v191_v11 }
 0x148   :  { %v190_v12 = vmul.f32 %v188_v10, %v188_v10 }
 0x14a   :  { %v194_v13 = vsel %vm177_vm0, %v190_v12, 0.0 }
 0x14b   :  { %195 = vadd.xlane.f32.xlu1 %v194_v13 }
 0x1d4   :  { %v193_v17 = vpop.xlane.xlu1 %192 }
 0x1d5   :  { %v197_v18 = vmul.f32 0.03125, %v193_v17 }
 0x1d7   :  { %v199_v19 = vadd.f32 1e-06, %v197_v18 }
 0x1d8   :  { %v196_v20 = vpop.xlane.xlu1 %195 }
 0x1d9   :  { %1614 = vrsqrt.f32 %v199_v19  ;;  %v198_v21 = vmul.f32 0.03125, %v196_v20 }
 0x1db   :  { %v200_v22 = vadd.f32 1e-06, %v198_v21 }
 0x1dd   :  { %1616 = vrsqrt.f32 %v200_v22 }
 0x1e3   :  { %v1615_v23 = vpop.eup %1614 }
 0x1e4   :  { %v203_v24 = vmul.f32 %v1615_v23, %v187_v6 }
 0x1e6   :  { %v211_v28 = vmul.f32 %v1359_v25, %v203_v24 }
 0x1e7   :  { %v1617_v26 = vpop.eup %1616 }
 0x1e8   :  { %v204_v27 = vmul.f32 %v1617_v26, %v188_v10  ;;  %v219_v31 = vadd.f32 %v1360_v29, %v211_v28 }
 0x1ea   :  { %v212_v30 = vmul.f32 %v1359_v25, %v204_v27 }
 0x1ec   :  { %v220_v32 = vadd.f32 %v1360_v29, %v212_v30 }
 0x1ee   :  { %v221_v33 = vpack.c.bf16 %v220_v32, %v219_v31 }
 0x1f0   :  { %1456 = vmatmul.mubr.msk.bf16.vlgmr.msra.gmra.mrb[0].mxu0 %vm177_vm0, %v221_v33 }
 0x2c3   :  { %v282_v35 = vpop.f32.mrb[0].mxu0 }
 0x2c4   :  { %v283_v36 = vadd.f32 %v1361_v34, %v282_v35  ;;  %v1457_v37 = vpop.f32.mrb[1].mxu0 }
 0x2c5   :  { %v285_v38 = vpop.f32.mrb[2].mxu0 }
 0x2c6   :  { %290 = vst.msk [vmem:[#allocation2] sm:$0xff] %vm289_vm2, %v283_v36  ;;  %v286_v39 = vadd.f32 %v1361_v34, %v285_v38  ;;  %v1458_v40 = vpop.f32.mrb[3].mxu0 }
 0x2c8   :  { %291 = vst.msk [vmem:[#allocation2 + $0x8] sm:$0xff] %vm289_vm2, %v286_v39 }
 0x2c9 LB: > { %v1915_v41 = vmov 0.0   ;;  %vm1916_vm3 = vmmov 0   ;;  %s1365_s3 = sshll.u32 %s1898_s4, 3  ;;  %s1917_s7 = smov 96   ;;  %vm305_vm4 = vcmask 64512   ;;  %vm369_vm5 = vcmask 1043456   ;;  %s1898_s4 = sphi %s2163_s4, %s297_s4  }
 0x2ca   : > { %1459 = vmatprep.subr.bf16.mxu0 %v1915_v41  ;;  %1461 = vmatprep.mubr.msk.bf16.mxu0 %vm1916_vm3, %v1915_v41  ;;  %s299_s0 = scalar_lea.vmem [#allocation2], %s1365_s3  ;;  %s1918_s8 = smov 64   ;;  %vm756_vm6 = vcmask 130048   ;;  %vm758_vm7 = vcmask 195584  }
 0x2cb   : > { %1465 = vmatprep.subr.bf16.mxu1 %v1915_v41  ;;  %1467 = vmatprep.mubr.msk.bf16.mxu1 %vm1916_vm3, %v1915_v41  ;;  %s1919_s1 = smov 88   ;;  %s1920_s30 = smov 72  }
 0x2cc   : > { %s1921_s20 = smov 120   ;;  %s1922_s21 = smov 80  }
 0x2cd   : > { %s1923_s6 = smov 112   ;;  %s1924_s5 = smov 104  }
 0x2ce   : > { %s1925_s19 = smov 56   ;;  %s1926_s22 = smov 48  }
 0x2cf   : > { %v300_v42 = vld [vmem:[%s299_s0] sm:$0xff]  ;;  %s1927_s25 = smov 40   ;;  %s1928_s27 = smov 8  }
 0x2d0   : > { %v2177_v43 = vpack.c.bf16 %v300_v42, %v300_v42  ;;  %s1929_s18 = smov 16   ;;  %s1930_s9 = smov 24  }
 0x2d1   : > { %s760_s28 = scalar_lea.vmem [#allocation3], %s1365_s3  ;;  %s297_s4 = sadd.s32 1, %s1898_s4  }
 0x2d2   : > { %303 = vrot.lane.b32.xlu0 %v2177_v43, %s1917_s7  ;;  %364 = vrot.lane.b32.xlu1 %v2177_v43, %s1918_s8  ;;  %p294_p2 = scmp.ge.s32.totalorder %s297_s4, 2  }
 0x2d3   :  { %s2393_s26 = sld [smem:[#allocation27_spill]] (%p294_p2)  ;;  %vm1036_vm15 = vcmask (%p294_p2), 523264  }
 0x2d6   : > { %415 = vrot.lane.b32.xlu1 %v2177_v43, %s1919_s1 }
 0x344   : > { %v304_v44 = vpop.permute.xlu0 %303  ;;  %v365_v51 = vpop.permute.xlu1 %364 }
 0x345   : > { %v310_v45 = vsel %vm305_vm4, %v304_v44, 0  ;;  %v371_v52 = vsel %vm369_vm5, %v365_v51, 0 }
 0x346   : > { %1460 = vmatpush3.bf16.xpose.msra.mxu0 %v310_v45  ;;  %1466 = vmatpush3.bf16.msra.mxu1 %v371_v52 }
 0x347   : > { %1477 = vmatprep.subr.bf16.mxu0 %v1915_v41  ;;  %1471 = vmatprep.subr.bf16.mxu1 %v1915_v41 }
 0x348   : > { %v416_v58 = vpop.permute.xlu1 %415 }
 0x349   : > { %v421_v0 = vsel %vm305_vm4, %v416_v58, 0 }
 0x34d   : > { %1462 = vmatmul.mubr.msk.bf16.vlgmr.msra.gmra.mrb[0].mxu0 %vm305_vm4, %v2177_v43 }
 0x34e   : > { %1479 = vmatprep.mubr.msk.bf16.mxu0 %vm1916_vm3, %v1915_v41 }
 0x420   : > { %v346_v46 = vpop.f32.mrb[0].mxu0 }
 0x421   : > { %v1463_v47 = vpop.f32.mrb[1].mxu0  ;;  %v352_v48 = vsel %vm305_vm4, %v346_v46, -inf }
 0x422   : > { %353 = vmax.xlane.f32.xlu0 %v352_v48  ;;  %v349_v49 = vpop.f32.mrb[2].mxu0 }
 0x423   : > { %v1464_v50 = vpop.f32.mrb[3].mxu0 }
 0x438   : > { %635 = vrot.lane.b32.xlu0 %v2177_v43, %s1920_s30 }
 0x4af   : > { %v354_v53 = vpop.xlane.xlu0 %353 }
 0x4b0   : > { %v355_v54 = vsub.f32 %v346_v46, %v354_v53 }
 0x4b2   : > { %v356_v55 = vmul.f32 1.442695, %v355_v54 }
 0x4b3   : > { %v636_v3 = vpop.permute.xlu0 %635 }
 0x4b4   : > { %1618 = vpow2.f32 %v356_v55  ;;  %v641_v5 = vsel %vm305_vm4, %v636_v3, 0 }
 0x4be   : > { %v1619_v56 = vpop.eup %1618 }
 0x4bf   : > { %v358_v57 = vsel %vm305_vm4, %v1619_v56, 0.0 }
 0x4c0   : > { %359 = vadd.xlane.f32.xlu1 %v358_v57 }
 0x4d1   : > { %413 = vrot.lane.b32.xlu1 %v2177_v43, %s1921_s20 }
 0x4d5   : > { %525 = vrot.lane.b32.xlu1 %v2177_v43, %s1922_s21 }
 0x4d9   : > { %523 = vrot.lane.b32.xlu1 %v2177_v43, %s1923_s6 }
 0x4dd   : > { %633 = vrot.lane.b32.xlu1 %v2177_v43, %s1924_s5 }
 0x54d   : > { %v360_v59 = vpop.xlane.xlu1 %359 }
 0x54e   : > { %1620 = vrcp.f32 %v360_v59 }
 0x551   : > { %v414_v62 = vpop.permute.xlu1 %413 }
 0x555   : > { %v526_v1 = vpop.permute.xlu1 %525 }
 0x556   : > { %v531_v2 = vsel %vm305_vm4, %v526_v1, 0 }
 0x558   : > { %v1621_v60 = vpop.eup %1620 }
 0x559   : > { %v362_v61 = vmul.f32 %v1621_v60, %v1619_v56  ;;  %v524_v4 = vpop.permute.xlu1 %523 }
 0x55b   : > { %v363_v63 = vpack.c.bf16 %v362_v61, %v362_v61 }
 0x55d   : > { %1468 = vmatmul.mubr.msk.bf16.vlgmr.msra.gmra.mrb[0].mxu1 %vm305_vm4, %v363_v63  ;;  %v634_v6 = vpop.permute.xlu1 %633 }
 0x55e   : > { %1472 = vmatpush3.bf16.xpose.msra.mxu1 %v421_v0  ;;  %1473 = vmatprep.mubr.msk.bf16.mxu1 %vm1916_vm3, %v1915_v41 }
 0x55f   : > { %1483 = vmatprep.subr.bf16.mxu1 %v1915_v41 }
 0x565   : > { %1474 = vmatmul.mubr.msk.bf16.vlgmr.msra.gmra.mrb[4].mxu1 %vm305_vm4, %v414_v62 }
 0x566   : > { %1484 = vmatpush3.bf16.xpose.msra.mxu1 %v531_v2  ;;  %1485 = vmatprep.mubr.msk.bf16.mxu1 %vm1916_vm3, %v1915_v41 }
 0x567   : > { %1495 = vmatprep.subr.bf16.mxu1 %v1915_v41 }
 0x56d   : > { %1486 = vmatmul.mubr.msk.bf16.vlgmr.msra.gmra.mrb[8].mxu1 %vm305_vm4, %v524_v4 }
 0x56e   : > { %1496 = vmatpush3.bf16.xpose.msra.mxu1 %v641_v5  ;;  %1497 = vmatprep.mubr.msk.bf16.mxu1 %vm1916_vm3, %v1915_v41 }
 0x56f   :  { %1515 = vmatprep.subr.bf16.mxu1 (%p294_p2), %v1913_v15 }
 0x575   : > { %1498 = vmatmul.mubr.msk.bf16.vlgmr.msra.gmra.mrb[12].mxu1 %vm305_vm4, %v634_v6 }
 0x576   :  { %1519 = vmatprep.mubr.msk.bf16.mxu1 (%p294_p2), %vm1914_vm1, %v1913_v15 }
 0x630   : > { %v2212_v7 = vpop.f32.mrb[0].mxu1 }
 0x631   : > { %v1469_v8 = vpop.f32.mrb[1].mxu1 }
 0x632   : > { %v410_v9 = vpop.f32.mrb[2].mxu1 }
 0x633   : > { %v1470_v10 = vpop.f32.mrb[3].mxu1 }
 0x638   : > { %v457_v11 = vpop.f32.mrb[4].mxu1 }
 0x639   : > { %v1475_v12 = vpop.f32.mrb[5].mxu1  ;;  %v463_v13 = vsel %vm305_vm4, %v457_v11, -inf }
 0x63a   : > { %464 = vmax.xlane.f32.xlu1 %v463_v13  ;;  %v460_v14 = vpop.f32.mrb[6].mxu1 }
 0x63b   : > { %v1476_v16 = vpop.f32.mrb[7].mxu1 }
 0x63c   :  { %v1636_v16 = vld [vmem:[#allocation10] sm:$0xff] (%p294_p2)  }
 0x640   : > { %v567_v17 = vpop.f32.mrb[8].mxu1 }
 0x641   : > { %v573_v18 = vsel %vm305_vm4, %v567_v17, -inf  ;;  %v1487_v19 = vpop.f32.mrb[9].mxu1 }
 0x642   : > { %574 = vmax.xlane.f32.xlu0 %v573_v18  ;;  %v570_v20 = vpop.f32.mrb[10].mxu1 }
 0x643   : > { %v1488_v21 = vpop.f32.mrb[11].mxu1  ;;  %v1374_v20 = vld [vmem:[#allocation12] ss:$0 sm:$0xff] (%p294_p2) }
 0x648   : > { %v677_v22 = vpop.f32.mrb[12].mxu1 }
 0x649   : > { %v683_v23 = vsel %vm305_vm4, %v677_v22, -inf  ;;  %v1499_v24 = vpop.f32.mrb[13].mxu1 }
 0x64a   : > { %684 = vmax.xlane.f32.xlu1 %v683_v23  ;;  %v680_v25 = vpop.f32.mrb[14].mxu1 }
 0x64b   : > { %v1500_v26 = vpop.f32.mrb[15].mxu1 }
 0x64c   :  { %v833_v26 = vld [vmem:[#allocation4 + $0x8] sm:$0xff] (%p294_p2) }
 0x6c7   : > { %v465_v27 = vpop.xlane.xlu1 %464 }
 0x6c8   : > { %v466_v28 = vsub.f32 %v457_v11, %v465_v27 }
 0x6ca   : > { %v467_v29 = vmul.f32 1.442695, %v466_v28 }
 0x6cc   : > { %1622 = vpow2.f32 %v467_v29 }
 0x6cf   : > { %v575_v37 = vpop.xlane.xlu0 %574 }
 0x6d0   : > { %v576_v38 = vsub.f32 %v567_v17, %v575_v37 }
 0x6d2   : > { %v577_v39 = vmul.f32 1.442695, %v576_v38 }
 0x6d6   : > { %v1623_v30 = vpop.eup %1622 }
 0x6d7   : > { %v685_v31 = vpop.xlane.xlu1 %684  ;;  %v469_v32 = vsel %vm305_vm4, %v1623_v30, 0.0 }
 0x6d8   : > { %v686_v33 = vsub.f32 %v677_v22, %v685_v31  ;;  %470 = vadd.xlane.f32.xlu1 %v469_v32  ;;  %v832_v22 = vld [vmem:[#allocation4] sm:$0xff] (%p294_p2) }
 0x6da   : > { %v687_v34 = vmul.f32 1.442695, %v686_v33 }
 0x6dc   : > { %1624 = vpow2.f32 %v687_v34 }
 0x6dd   : > { %1626 = vpow2.f32 %v577_v39 }
 0x6e6   : > { %v1625_v35 = vpop.eup %1624 }
 0x6e7   : > { %v689_v36 = vsel %vm305_vm4, %v1625_v35, 0.0  ;;  %v1627_v40 = vpop.eup %1626 }
 0x6e8   : > { %690 = vadd.xlane.f32.xlu0 %v689_v36  ;;  %v579_v42 = vsel %vm305_vm4, %v1627_v40, 0.0 }
 0x6e9   : > { %475 = vrot.lane.b32.xlu1 %v2177_v43, %s1925_s19 }
 0x6fe   : > { %585 = vrot.lane.b32.xlu0 %v2177_v43, %s1926_s22 }
 0x70d   : > { %580 = vadd.xlane.f32.xlu1 %v579_v42 }
 0x71e   : > { %695 = vrot.lane.b32.xlu1 %v2177_v43, %s1927_s25 }
 0x765   : > { %v471_v44 = vpop.xlane.xlu1 %470 }
 0x766   : > { %1628 = vrcp.f32 %v471_v44 }
 0x769   : > { %v476_v45 = vpop.permute.xlu1 %475 }
 0x76a   : > { %v481_v46 = vsel %vm369_vm5, %v476_v45, 0  ;;  %v1638_v45 = vld [vmem:[#allocation16] sm:$0xff] (%p294_p2)  }
 0x76b   : > { %1478 = vmatpush3.bf16.msra.mxu0 %v481_v46  ;;  %1516 = vmatpush3.bf16.msra.mxu1 (%p294_p2), %v1638_v45  ;;  %v1639_v46 = vld [vmem:[#allocation16 + $0x8] sm:$0xff] (%p294_p2)  }
 0x76c   : > { %1489 = vmatprep.subr.bf16.mxu0 %v1915_v41  ;;  %1517 = vmatprep.subr.bf16.mxu1 (%p294_p2), %v1913_v15 }
 0x76f   :  { %1518 = vmatpush3.bf16.msra.mxu1 (%p294_p2), %v1639_v46 }
 0x770   : > { %v1629_v47 = vpop.eup %1628  ;;  %1535 = vmatprep.subr.bf16.mxu1 (%p294_p2), %v1913_v15 }
 0x771   : > { %v473_v48 = vmul.f32 %v1629_v47, %v1623_v30  ;;  %v953_v47 = vld [vmem:[%s2393_s26 + $0x8] sm:$0xff] (%p294_p2) }
 0x772   :  { %vm955_vm8 = vcmp.ne.s32.totalorder (%p294_p2), %v953_v47, 0  ;;  %vm976_vm11 = vcmp.ne.s32.totalorder (%p294_p2), %v953_v47, 7  ;;  %v1649_v47 = vld [vmem:[%s2379_s14 + $0x8] sm:$0xff] (%p294_p2)  }
 0x773   : > { %v474_v49 = vpack.c.bf16 %v473_v48, %v473_v48  ;;  %v952_v48 = vld [vmem:[%s2393_s26] sm:$0xff] (%p294_p2) }
 0x774   :  { %vm975_vm9 = vcmp.ne.s32.totalorder (%p294_p2), %v952_v48, 7  ;;  %vm954_vm10 = vcmp.ne.s32.totalorder (%p294_p2), %v952_v48, 0  ;;  %v1650_v48 = vld [vmem:[%s2379_s14 + $0x10] sm:$0xff] (%p294_p2)  }
 0x775   : > { %1480 = vmatmul.mubr.msk.bf16.vlgmr.msra.gmra.mrb[4].mxu0 %vm305_vm4, %v474_v49  ;;  %v691_v50 = vpop.xlane.xlu0 %690  ;;  %v1931_v49 = vmov (%p294_p2), 0  }
 0x776   : > { %1491 = vmatprep.mubr.msk.bf16.mxu0 %vm1916_vm3, %v1915_v41  ;;  %1635 = vset.pattern.permute.xlu1 (%p294_p2), %v1931_v49 }
 0x777   :  { %1634 = vset.pattern.permute.xlu0 (%p294_p2), %v1931_v49 }
 0x779   : > { %v586_v51 = vpop.permute.xlu0 %585 }
 0x77a   : > { %v591_v43 = vsel %vm369_vm5, %v586_v51, 0  ;;  %v964_v51 = vsel (%p294_p2), %vm955_vm8, 1, %v1931_v49 }
 0x77b   : > { %1490 = vmatpush3.bf16.msra.mxu0 %v591_v43  ;;  %v963_v43 = vsel (%p294_p2), %vm954_vm10, 1, %v1931_v49 }
 0x77c   : > { %1501 = vmatprep.subr.bf16.mxu0 %v1915_v41 }
 0x79a   : > { %v581_v52 = vpop.xlane.xlu1 %580 }
 0x79b   : > { %1630 = vrcp.f32 %v581_v52  ;;  %v982_v52 = vsel (%p294_p2), %vm975_vm9, 1, %v1931_v49 }
 0x79c   : > { %1632 = vrcp.f32 %v691_v50  ;;  %v1641_v50 = vld [vmem:[%s2377_s12] sm:$0xff] (%p294_p2)  }
 0x79e   : > { %v696_v54 = vpop.permute.xlu1 %695 }
 0x79f   : > { %v701_v56 = vsel %vm369_vm5, %v696_v54, 0 }
 0x7a5   : > { %v1631_v53 = vpop.eup %1630 }
 0x7a6   : > { %v583_v55 = vmul.f32 %v1631_v53, %v1627_v40  ;;  %v1633_v58 = vpop.eup %1632  ;;  %v983_v53 = vsel (%p294_p2), %vm976_vm11, 1, %v1931_v49  ;;  %v1651_v49 = vld [vmem:[%s2379_s14 + $0x18] sm:$0xff] (%p294_p2)  }
 0x7a7   : > { %v693_v59 = vmul.f32 %v1633_v58, %v1625_v35 }
 0x7a8   : > { %v584_v57 = vpack.c.bf16 %v583_v55, %v583_v55 }
 0x7a9   : > { %v694_v60 = vpack.c.bf16 %v693_v59, %v693_v59 }
 0x7aa   : > { %1492 = vmatmul.mubr.msk.bf16.vlgmr.msra.gmra.mrb[8].mxu0 %vm305_vm4, %v584_v57 }
 0x7ab   : > { %1502 = vmatpush3.bf16.msra.mxu0 %v701_v56  ;;  %1503 = vmatprep.mubr.msk.bf16.mxu0 %vm1916_vm3, %v1915_v41 }
 0x7ac   :  { %1507 = vmatprep.subr.bf16.mxu0 (%p294_p2), %v1913_v15 }
 0x7b2   : > { %1504 = vmatmul.mubr.msk.bf16.vlgmr.msra.gmra.mrb[12].mxu0 %vm305_vm4, %v694_v60 }
 0x7b3   :  { %1511 = vmatprep.mubr.msk.bf16.mxu0 (%p294_p2), %vm1914_vm1, %v1913_v15  ;;  %1508 = vmatpush3.bf16.msra.mxu0 (%p294_p2), %v1636_v16 }
 0x7b4   :  { %1509 = vmatprep.subr.bf16.mxu0 (%p294_p2), %v1913_v15 }
 0x848   : > { %v517_v61 = vpop.f32.mrb[4].mxu0 }
 0x849   : > { %744 = vrot.lane.b32.xlu1 %v517_v61, %s1928_s27  ;;  %v1481_v62 = vpop.f32.mrb[5].mxu0 }
 0x84a   : > { %v520_v63 = vpop.f32.mrb[6].mxu0  ;;  %v1378_v62 = vld [vmem:[#allocation13] ss:$0 sm:$0xff] (%p294_p2) }
 0x84b   : > { %v1482_v0 = vpop.f32.mrb[7].mxu0 }
 0x87d   : > { %v627_v1 = vpop.f32.mrb[8].mxu0 }
 0x87e   : > { %748 = vrot.lane.b32.xlu0 %v627_v1, %s1929_s18  ;;  %v1493_v2 = vpop.f32.mrb[9].mxu0 }
 0x87f   : > { %v630_v3 = vpop.f32.mrb[10].mxu0  ;;  %v1379_v2 = vld [vmem:[#allocation15] ss:$0 sm:$0xff] (%p294_p2) }
 0x880   : > { %v1494_v4 = vpop.f32.mrb[11].mxu0 }
 0x885   : > { %v737_v5 = vpop.f32.mrb[12].mxu0 }
 0x886   : > { %752 = vrot.lane.b32.xlu1 %v737_v5, %s1930_s9  ;;  %v1505_v41 = vpop.f32.mrb[13].mxu0 }
 0x887   : > { %v740_v6 = vpop.f32.mrb[14].mxu0  ;;  %v1640_v41 = vld [vmem:[%s2378_s13] sm:$0xff] (%p294_p2)  }
 0x888   : > { %v1506_v8 = vpop.f32.mrb[15].mxu0 }
 0x889   :  { %v1642_v8 = vld [vmem:[%s2378_s13 + $0x8] sm:$0xff] (%p294_p2)  }
 0x8bb   : > { %v745_v9 = vpop.permute.xlu1 %744 }
 0x8bc   : > { %v755_v11 = vsel %vm305_vm4, %v2212_v7, %v745_v9  ;;  %v1637_v7 = vld [vmem:[#allocation10 + $0x8] sm:$0xff] (%p294_p2)  }
 0x8bd   :  { %1510 = vmatpush3.bf16.msra.mxu0 (%p294_p2), %v1637_v7  ;;  %v1643_v9 = vld [vmem:[%s2377_s12 + $0x8] sm:$0xff] (%p294_p2)   ;;  %v958_v7 = vlaneseq (%p294_p2) }
 0x8be   :  { %1523 = vmatprep.subr.bf16.mxu0 (%p294_p2), %v1913_v15 }
 0x8f0   : > { %v749_v10 = vpop.permute.xlu0 %748 }
 0x8f1   : > { %v757_v12 = vsel %vm756_vm6, %v755_v11, %v749_v10  ;;  %v1644_v10 = vld [vmem:[%s2378_s13 + $0x10] sm:$0xff] (%p294_p2)  }
 0x8f2   :  { %v1645_v11 = vld [vmem:[%s2377_s12 + $0x10] sm:$0xff] (%p294_p2)  }
 0x8f4   :  { %296 = sbr.rel (!%p294_p2) target bundleno = 713 (0x2c9), region = 137 }
 0x8f8   : > { %v753_v13 = vpop.permute.xlu1 %752 }
 0x8f9   : > { %v759_v14 = vsel %vm758_vm7, %v757_v12, %v753_v13  ;;  %v1646_v12 = vld [vmem:[%s2378_s13 + $0x18] sm:$0xff] (%p294_p2)  }
 0x8fa   : > { %761 = vst.msk [vmem:[%s760_s28] sm:$0xff] %vm177_vm0, %v759_v14  ;;  %v1647_v13 = vld [vmem:[%s2377_s12 + $0x18] sm:$0xff] (%p294_p2)  }
 0x901   :  { %v762_v17 = vld [vmem:[#allocation3] sm:$0xff]  ;;  %v763_v18 = vld [vmem:[#allocation3 + $0x8] sm:$0xff] }
 0x902   :  { %v764_v19 = vpack.c.bf16 %v763_v18, %v762_v17  ;;  %v1380_v17 = vld [vmem:[#allocation18] ss:$0 sm:$0xff] }
 0x904   :  { %1512 = vmatmul.mubr.msk.bf16.vlgmr.msra.gmra.mrb[0].mxu0 %vm177_vm0, %v764_v19 }
 0x905   :  { %1531 = vmatprep.mubr.msk.bf16.mxu0 %vm1914_vm1, %v1913_v15  ;;  %1524 = vmatpush3.bf16.msra.mxu0 %v1641_v50  ;;  %v1652_v50 = vld [vmem:[%s2381_s16] sm:$0xff]  }
 0x906   :  { %1525 = vmatprep.subr.bf16.mxu0 %v1913_v15 }
 0x909   :  { %1526 = vmatpush3.bf16.msra.mxu0 %v1643_v9 }
 0x90a   :  { %1527 = vmatprep.subr.bf16.mxu0 %v1913_v15 }
 0x90d   :  { %1528 = vmatpush3.bf16.msra.mxu0 %v1645_v11 }
 0x90e   :  { %1529 = vmatprep.subr.bf16.mxu0 %v1913_v15 }
 0x911   :  { %1530 = vmatpush3.bf16.msra.mxu0 %v1647_v13 }
 0x912   :  { %1547 = vmatprep.subr.bf16.mxu0 %v1913_v15 }
 0x9d7   :  { %v825_v21 = vpop.f32.mrb[0].mxu0 }
 0x9d8   :  { %v826_v23 = vadd.f32 %v1374_v20, %v825_v21  ;;  %v1513_v24 = vpop.f32.mrb[1].mxu0  ;;  %v959_v21 = vshrl.u32 %v958_v7, 7 }
 0x9d9   :  { %v828_v25 = vpop.f32.mrb[2].mxu0 }
 0x9da   :  { %v834_v27 = vadd.f32 %v832_v22, %v826_v23  ;;  %v829_v28 = vadd.f32 %v1374_v20, %v828_v25  ;;  %v1514_v29 = vpop.f32.mrb[3].mxu0  ;;  %vm979_vm13 = vcmp.lt.s32.totalorder %v959_v21, 7  ;;  %vm960_vm14 = vcmp.lt.s32.totalorder %v959_v21, 1 }
 0x9dc   :  { %836 = vst.msk [vmem:[#allocation3] sm:$0xff] %vm177_vm0, %v834_v27  ;;  %v835_v30 = vadd.f32 %v833_v26, %v829_v28  ;;  %v840_v31 = vsel %vm177_vm0, %v834_v27, 0.0 }
 0x9dd   :  { %841 = vadd.xlane.f32.xlu0 %v840_v31 }
 0x9de   :  { %837 = vst.msk [vmem:[#allocation3 + $0x8] sm:$0xff] %vm177_vm0, %v835_v30  ;;  %v843_v32 = vsel %vm177_vm0, %v835_v30, 0.0 }
 0x9e1   :  { %844 = vadd.xlane.f32.xlu0 %v843_v32 }
 0x9f7   :  { %966 = vperm.xlu0 %1634, %v963_v43   ;;  %v1654_v43 = vld [vmem:[%s2381_s16 + $0x10] sm:$0xff]  }
 0xa6a   :  { %v842_v33 = vpop.xlane.xlu0 %841 }
 0xa6b   :  { %v846_v34 = vmul.f32 0.03125, %v842_v33 }
 0xa6d   :  { %v848_v35 = vsub.f32 %v834_v27, %v846_v34 }
 0xa6e   :  { %v845_v36 = vpop.xlane.xlu0 %844 }
 0xa6f   :  { %v847_v37 = vmul.f32 0.03125, %v845_v36  ;;  %v850_v38 = vmul.f32 %v848_v35, %v848_v35 }
 0xa71   :  { %v849_v39 = vsub.f32 %v835_v30, %v847_v37  ;;  %v852_v40 = vsel %vm177_vm0, %v850_v38, 0.0 }
 0xa72   :  { %853 = vadd.xlane.f32.xlu1 %v852_v40 }
 0xa73   :  { %v851_v42 = vmul.f32 %v849_v39, %v849_v39 }
 0xa75   :  { %v855_v44 = vsel %vm177_vm0, %v851_v42, 0.0 }
 0xa76   :  { %856 = vadd.xlane.f32.xlu1 %v855_v44  ;;  %v967_v27 = vpop.permute.xlu0 %966  ;;  %v1648_v44 = vld [vmem:[%s2379_s14] sm:$0xff]  }
 0xa77   :  { %vm971_vm4 = vcmp.eq.s32.totalorder %v967_v27, 1 }
 0xa87   :  { %969 = vperm.xlu1 %1635, %v964_v51   ;;  %v1653_v51 = vld [vmem:[%s2381_s16 + $0x8] sm:$0xff]  }
 0xa8b   :  { %985 = vperm.xlu1 %1635, %v982_v52   ;;  %v1655_v52 = vld [vmem:[%s2381_s16 + $0x18] sm:$0xff]  }
 0xa8f   :  { %988 = vperm.xlu1 %1635, %v983_v53  }
 0xaff   :  { %v854_v54 = vpop.xlane.xlu1 %853 }
 0xb00   :  { %v858_v55 = vmul.f32 0.03125, %v854_v54 }
 0xb02   :  { %v860_v56 = vadd.f32 1e-06, %v858_v55 }
 0xb03   :  { %v857_v57 = vpop.xlane.xlu1 %856 }
 0xb04   :  { %1656 = vrsqrt.f32 %v860_v56  ;;  %v859_v58 = vmul.f32 0.03125, %v857_v57 }
 0xb06   :  { %v861_v59 = vadd.f32 1e-06, %v859_v58 }
 0xb07   :  { %v970_v14 = vpop.permute.xlu1 %969 }
 0xb08   :  { %1658 = vrsqrt.f32 %v861_v59  ;;  %vm972_vm12 = vcmp.eq.s32.totalorder %v970_v14, 1 }
 0xb0b   :  { %v986_v16 = vpop.permute.xlu1 %985 }
 0xb0c   :  { %vm990_vm2 = vcmp.eq.s32.totalorder %v986_v16, 1  ;;  %v1323_v16 = vld [vmem:[#allocation3] sm:$0xff] }
 0xb0e   :  { %v1657_v60 = vpop.eup %1656 }
 0xb0f   :  { %v864_v61 = vmul.f32 %v1657_v60, %v848_v35  ;;  %v989_v23 = vpop.permute.xlu1 %988 }
 0xb10   :  { %vm991_vm3 = vcmp.eq.s32.totalorder %v989_v23, 1 }
 0xb11   :  { %v872_v1 = vmul.f32 %v1378_v62, %v864_v61 }
 0xb12   :  { %v1659_v63 = vpop.eup %1658 }
 0xb13   :  { %v865_v0 = vmul.f32 %v1659_v63, %v849_v39  ;;  %v880_v4 = vadd.f32 %v1379_v2, %v872_v1 }
 0xb15   :  { %v873_v3 = vmul.f32 %v1378_v62, %v865_v0 }
 0xb17   :  { %v881_v5 = vadd.f32 %v1379_v2, %v873_v3 }
 0xb19   :  { %v882_v6 = vpack.c.bf16 %v881_v5, %v880_v4 }
 0xb1b   :  { %1520 = vmatmul.mubr.msk.bf16.vlgmr.msra.gmra.mrb[0].mxu1 %vm177_vm0, %v882_v6 }
 0xb1c   :  { %1536 = vmatpush3.bf16.msra.mxu1 %v1640_v41  ;;  %1543 = vmatprep.mubr.msk.bf16.mxu1 %vm1914_vm1, %v1913_v15 }
 0xb1d   :  { %1537 = vmatprep.subr.bf16.mxu1 %v1913_v15 }
 0xb20   :  { %1538 = vmatpush3.bf16.msra.mxu1 %v1642_v8 }
 0xb21   :  { %1539 = vmatprep.subr.bf16.mxu1 %v1913_v15 }
 0xb24   :  { %1540 = vmatpush3.bf16.msra.mxu1 %v1644_v10  ;;  %v1400_v10 = vld [vmem:[%s2382_s17] ss:$0 sm:$0xff] }
 0xb25   :  { %1541 = vmatprep.subr.bf16.mxu1 %v1913_v15 }
 0xb28   :  { %1542 = vmatpush3.bf16.msra.mxu1 %v1646_v12 }
 0xb29   :  { %1559 = vmatprep.subr.bf16.mxu1 %v1913_v15 }
 0xbee   :  { %v943_v18 = vpop.f32.mrb[0].mxu1 }
 0xbef   :  { %v944_v19 = vadd.f32 %v1380_v17, %v943_v18  ;;  %v1521_v20 = vpop.f32.mrb[1].mxu1 }
 0xbf0   :  { %v946_v22 = vpop.f32.mrb[2].mxu1 }
 0xbf1   :  { %v950_v24 = vmax.f32 %v944_v19, 0.0  ;;  %v947_v25 = vadd.f32 %v1380_v17, %v946_v22  ;;  %v1522_v26 = vpop.f32.mrb[3].mxu1  ;;  %v1324_v19 = vld [vmem:[#allocation3 + $0x8] sm:$0xff] }
 0xbf3   :  { %v951_v28 = vmax.f32 %v947_v25, 0.0  ;;  %v956_v29 = vrot.slane %v950_v24, 7  ;;  %v977_v30 = vrot.slane %v950_v24, 1 }
 0xbf5   :  { %v957_v31 = vrot.slane %v951_v28, 7  ;;  %v978_v32 = vrot.slane %v951_v28, 1  ;;  %v994_v33 = vpack.c.bf16 %v951_v28, %v950_v24 }
 0xbf7   :  { %v980_v34 = vsel %vm979_vm13, %v977_v30, %v978_v32  ;;  %v981_v35 = vsel %vm979_vm13, %v978_v32, %v977_v30  ;;  %v961_v36 = vsel %vm960_vm14, %v956_v29, %v957_v31  ;;  %v962_v37 = vsel %vm960_vm14, %v957_v31, %v956_v29  ;;  %1544 = vmatmul.mubr.msk.bf16.vlgmr.msra.gmra.mrb[4].mxu1 %vm1036_vm15, %v994_v33 }
 0xbf8   :  { %v992_v38 = vsel %vm990_vm2, %v980_v34, 0.0  ;;  %v993_v39 = vsel %vm991_vm3, %v981_v35, 0.0  ;;  %v974_v40 = vsel %vm972_vm12, %v961_v36, 0.0  ;;  %v973_v42 = vsel %vm971_vm4, %v962_v37, 0.0  ;;  %1567 = vmatprep.mubr.msk.bf16.mxu1 %vm1914_vm1, %v1913_v15  ;;  %1560 = vmatpush3.bf16.msra.mxu1 %v1652_v50 }
 0xbf9   :  { %v1149_v45 = vpack.c.bf16 %v993_v39, %v992_v38  ;;  %v1003_v46 = vpack.c.bf16 %v974_v40, %v973_v42  ;;  %1561 = vmatprep.subr.bf16.mxu1 %v1913_v15 }
 0xbfb   :  { %1532 = vmatmul.mubr.msk.bf16.vlgmr.msra.gmra.mrb[4].mxu0 %vm1036_vm15, %v1003_v46 }
 0xbfc   :  { %1548 = vmatpush3.bf16.msra.mxu0 %v1648_v44  ;;  %1555 = vmatprep.mubr.msk.bf16.mxu0 %vm1914_vm1, %v1913_v15 }
 0xbfd   :  { %1549 = vmatprep.subr.bf16.mxu0 %v1913_v15  ;;  %1562 = vmatpush3.bf16.msra.mxu1 %v1653_v51 }
 0xbfe   :  { %1563 = vmatprep.subr.bf16.mxu1 %v1913_v15 }
 0xc00   :  { %1550 = vmatpush3.bf16.msra.mxu0 %v1649_v47 }
 0xc01   :  { %1551 = vmatprep.subr.bf16.mxu0 %v1913_v15  ;;  %1564 = vmatpush3.bf16.msra.mxu1 %v1654_v43 }
 0xc02   :  { %1565 = vmatprep.subr.bf16.mxu1 %v1913_v15 }
 0xc04   :  { %1552 = vmatpush3.bf16.msra.mxu0 %v1650_v48 }
 0xc05   :  { %1553 = vmatprep.subr.bf16.mxu0 %v1913_v15  ;;  %1566 = vmatpush3.bf16.msra.mxu1 %v1655_v52  ;;  %v1399_v15 = vld [vmem:[%s2380_s15] ss:$0 sm:$0xff]  ;;  %s1932_s15 = smov [#allocation19]  }
 0xc06   :  { %s1334_s6 = sshll.u32 %s1932_s15, 4  ;;  %s1335_s6 = int_to_ptr.vmem [resolvable:$true] %s1334_s6 }
 0xc07   :  { %s1858_s5 = scalar_lea.vmem %s1335_s6, 256  ;;  %p1863_p4 = scmp.lt.s32.totalorder %s1335_s6, %s1335_s6 }
 0xc08   :  { %1554 = vmatpush3.bf16.msra.mxu0 %v1651_v49  ;;  %p1859_p3 = scmp.ne.s32.totalorder %s1335_s6, %s1858_s5  ;;  %p1864_p5 = scmp.lt.s32.totalorder %s1858_s5, %s1858_s5 }
 0xc0a   :  { %p1865_p6 = por %p1864_p5, %p1863_p4 }
 0xc0b   :  { %1556 = vmatmul.mubr.msk.bf16.vlgmr.msra.gmra.mrb[8].mxu0 %vm1036_vm15, %v1149_v45 }
 0xc0c   :  { %p1866_p7 = pnand %p1865_p6, %p1859_p3 }
 0xcca   :  { %v1142_v53 = vpop.f32.mrb[4].mxu1 }
 0xccb   :  { %v1545_v54 = vpop.f32.mrb[5].mxu1 }
 0xccc   :  { %v1145_v55 = vpop.f32.mrb[6].mxu1 }
 0xccd   :  { %v1546_v56 = vpop.f32.mrb[7].mxu1 }
 0xcce   :  { %v1074_v57 = vpop.f32.mrb[4].mxu0 }
 0xccf   :  { %v1143_v58 = vadd.f32 %v1142_v53, %v1074_v57  ;;  %v1533_v59 = vpop.f32.mrb[5].mxu0 }
 0xcd0   :  { %v1077_v60 = vpop.f32.mrb[6].mxu0 }
 0xcd1   :  { %v1146_v61 = vadd.f32 %v1145_v55, %v1077_v60  ;;  %v1534_v62 = vpop.f32.mrb[7].mxu0 }
 0xcde   :  { %v1219_v63 = vpop.f32.mrb[8].mxu0 }
 0xcdf   :  { %v1226_v0 = vadd.f32 %v1219_v63, %v1143_v58  ;;  %v1557_v1 = vpop.f32.mrb[9].mxu0 }
 0xce0   :  { %v1222_v2 = vpop.f32.mrb[10].mxu0 }
 0xce1   :  { %v1235_v3 = vadd.f32 %v1399_v15, %v1226_v0  ;;  %v1227_v4 = vadd.f32 %v1222_v2, %v1146_v61  ;;  %v1558_v5 = vpop.f32.mrb[11].mxu0 }
 0xce3   :  { %v1236_v41 = vadd.f32 %v1399_v15, %v1227_v4  ;;  %v1237_v6 = vmax.f32 %v1235_v3, 0.0 }
 0xce5   :  { %v1238_v8 = vmax.f32 %v1236_v41, 0.0 }
 0xce7   :  { %v1239_v9 = vpack.c.bf16 %v1238_v8, %v1237_v6 }
 0xce9   :  { %1568 = vmatmul.mubr.msk.bf16.vlgmr.msra.gmra.mrb[8].mxu1 %vm1036_vm15, %v1239_v9 }
 0xdbc   :  { %v1316_v11 = vpop.f32.mrb[8].mxu1 }
 0xdbd   :  { %v1317_v12 = vadd.f32 %v1400_v10, %v1316_v11  ;;  %v1569_v13 = vpop.f32.mrb[9].mxu1 }
 0xdbe   :  { %v1319_v14 = vpop.f32.mrb[10].mxu1 }
 0xdbf   :  { %v1320_v7 = vadd.f32 %v1400_v10, %v1319_v14  ;;  %v1570_v17 = vpop.f32.mrb[11].mxu1  ;;  %v1325_v18 = vadd.f32 %v1323_v16, %v1317_v12 }
 0xdc1   :  { %v1326_v20 = vadd.f32 %v1324_v19, %v1320_v7  ;;  %1327 = vst.msk [vmem:[#allocation19] sm:$0xff] %vm177_vm0, %v1325_v18 }
 0xdc3   :  { %1328 = vst.msk [vmem:[#allocation19 + $0x8] sm:$0xff] %vm177_vm0, %v1326_v20 }
 0xdc4   :  { %1869 = shalt.err (!%p1866_p7)
}
 0xdc5   :  { %s2394_s22 = sld [smem:[#allocation29_spill]] }
 0xdcb   :  { %s1870_s25 = scalar_lea.hbm %s2394_s22, 256 }
 0xdcc   :  { %p1871_p8 = scmp.ne.s32.totalorder %s2394_s22, %s1870_s25  ;;  %p1874_p9 = scmp.lt.u32.totalorder %s1870_s25, %s2394_s22 }
 0xdce   :  { %p1876_p10 = pnand %p1874_p9, %p1871_p8 }
 0xdd0   :  { %1879 = shalt.err (!%p1876_p10)
}
 0xdd1   :  { %1340 = dma.vmem_to_hbm [thread:$0]  %s1335_s6, 256, %s2394_s22, [#allocation6], %s1907_s10, %s1907_s10, %s1908_s2  }
 0xdd2   :  { %1894 = dma.done.wait [#allocation6], 256  }
 0xdd3   :  { %1895 = vsyncadd [#allocation6], 4294967040 }
 0xdd4   :  { %1344 = vsyncpa [#allocation5], 1 }
 0xdd5   :  { %1345 = vsyncpa [#allocation8], 1 }
 0xdd6   :  { %1346 = vsyncpa [#allocation11], 1 }
 0xdd7   :  { %1347 = vsyncpa [#allocation14], 1 }
 0xdd8   :  { %1348 = vsyncpa [#allocation17], 1 }
 0xdd9   :  { %1349 = vsyncpa [#allocation6], 1 }

</bundles_post_ra>
